<compile_context>
chip_gen: v7x
topology: tpu7x:2x2x1
jax: 0.10.0
libtpu: 0.0.40
codegen_flags: <defaults>
</compile_context>

<pallas_src>
import functools
import math

import jax
import jax.numpy as jnp
from jax.experimental import pallas as pl
from jax.experimental.pallas import tpu as pltpu

_EPS = 1e-5  # BatchNorm2d default eps


def _prelu(z, a):
    return jnp.where(z >= 0, z, a * z)


def _asa_kernel(x_ref, kc_ref, vc_ref,
                w_ref, b_ref, a_ref,
                wp_ref, bp_ref, ap_ref,
                out_ref, kvnew_ref,
                *, d_c, bb, F, T, Tc):
    C = x_ref.shape[-1]
    FT = F * T
    scale = 1.0 / math.sqrt(d_c)

    # ---- fused f_qkv + t_qk projection: one (bb*F*T, C) x (C, 5*d_c) matmul ----
    x2 = x_ref[...].reshape(bb * FT, C)
    qkv = jnp.dot(x2, w_ref[...], preferred_element_type=jnp.float32) + b_ref[0]
    qkv = _prelu(qkv, a_ref[0])                       # (bb*FT, 5*d_c): [qf|kf|v|qt|kt]

    # static block-diagonal mask: gram-matrix rows/cols sharing the same time step
    rt = jax.lax.broadcasted_iota(jnp.int32, (FT, FT), 0) % T
    ct = jax.lax.broadcasted_iota(jnp.int32, (FT, FT), 1) % T
    same_t = rt == ct

    t_out_rows = []
    kv_new = []
    for b in range(bb):
        blk = qkv[b * FT:(b + 1) * FT]                # rows ordered (f, t)
        qf = blk[:, 0 * d_c:1 * d_c]
        kf = blk[:, 1 * d_c:2 * d_c]
        v = blk[:, 2 * d_c:3 * d_c]
        qt = blk[:, 3 * d_c:4 * d_c].reshape(F, T, d_c)
        kt = blk[:, 4 * d_c:5 * d_c].reshape(F, T, d_c)

        # ---- frequency attention for all T steps at once (masked gram) ----
        s = jnp.einsum('ic,jc->ij', qf, kf, preferred_element_type=jnp.float32) * scale
        s = jnp.where(same_t, s, jnp.float32(-1e30))
        s = s - jnp.max(s, axis=-1, keepdims=True)
        e = jnp.exp(s)
        p = e * pl.reciprocal(jnp.sum(e, axis=-1, keepdims=True), approx=True)
        f_out = jnp.dot(p, v, preferred_element_type=jnp.float32)        # (FT, d_c)
        f_out_ftd = f_out.reshape(F, T, d_c)

        # ---- time attention over [cache | new] keys/values (register concats) ----
        kt_cat = jnp.concatenate([kc_ref[b], kt], axis=1)                # (F, Ttot, d_c)
        v_cat = jnp.concatenate([vc_ref[b], f_out_ftd], axis=1)
        ts = jnp.einsum('ftc,fyc->fty', qt, kt_cat,
                        preferred_element_type=jnp.float32) * scale
        ts = ts - jnp.max(ts, axis=0, keepdims=True)   # torch softmax(dim=1) of 'bfty'
        et = jnp.exp(ts)
        pt = et * pl.reciprocal(jnp.sum(et, axis=0, keepdims=True), approx=True)
        t_out = jnp.einsum('fty,fyc->ftc', pt, v_cat,
                           preferred_element_type=jnp.float32)           # (F, T, d_c)
        t_out_rows.append(t_out.reshape(FT, d_c))

        # only the fresh cache columns leave the kernel (packed lane-adjacent)
        kv_new.append(jnp.concatenate([kt, f_out_ftd], axis=-1))         # (F, T, 2*d_c)

    t_out_all = t_out_rows[0] if bb == 1 else jnp.concatenate(t_out_rows, axis=0)
    kv_new_all = kv_new[0][None] if bb == 1 else jnp.stack(kv_new, axis=0)

    # ---- proj (1x1 conv + BN + PReLU) and residual, fused over the batch block ----
    proj = jnp.dot(t_out_all, wp_ref[...], preferred_element_type=jnp.float32) + bp_ref[0]
    proj = _prelu(proj, ap_ref[0])
    out_ref[...] = (proj + x2).reshape(bb, F, T, C)
    kvnew_ref[...] = kv_new_all


def _fold_bn(W, gamma, beta, mean, var):
    s = gamma / jnp.sqrt(var + _EPS)
    return W * s[:, None], beta - mean * s


def _group_perm(d_c, k):
    # einops 'b (c k) f t -> k b c f t': channel i -> (c = i // k, group = i % k)
    return jnp.concatenate([jnp.arange(d_c) * k + j for j in range(k)])


def _pick_block_b(B):
    # biggest divisor of B that still leaves >=2 grid steps (dual-TC on v7x), capped at 8
    cap = max(1, min(8, B // 2))
    for bb in range(cap, 0, -1):
        if B % bb == 0:
            return bb
    return 1


def asa_pallas(inp, cache, params, block_b=None):
    """inp: (B, C, F, T) NCHW, cache: (B, 2*d_c, F, Tc).  Returns (out, new_cache) NCHW."""
    B, C, F, T = inp.shape
    d_c = C // 4
    Tc = cache.shape[-1]
    assert Tc >= 1
    bb = _pick_block_b(B) if block_b is None else block_b
    assert B % bb == 0

    # --- fold BN, regroup the '(c k)' interleave, fuse f_qkv + t_qk weights ---
    Wf, bf = _fold_bn(params['Wf'], params['gf'], params['bf'], params['mf'], params['vf'])
    pf = _group_perm(d_c, 3)
    Wt, bt = _fold_bn(params['Wt'], params['gt'], params['bt'], params['mt'], params['vt'])
    pt = _group_perm(d_c, 2)
    w_ft = jnp.concatenate([Wf[pf], Wt[pt]], axis=0).T                 # (C, 5*d_c)
    b_ft = jnp.concatenate([bf[pf], bt[pt]])[None, :]
    a_ft = jnp.concatenate([params['af'][pf], params['at'][pt]])[None, :]

    Wp, bpp = _fold_bn(params['Wp'], params['gp'], params['bp'], params['mp'], params['vp'])
    wp, bpp, ap = Wp.T, bpp[None, :], params['ap'][None, :]

    f32 = lambda v: v.astype(jnp.float32)
    x_ftc = f32(jnp.transpose(inp, (0, 2, 3, 1)))                      # (B, F, T, C)
    kc = f32(jnp.transpose(cache[:, :d_c], (0, 2, 3, 1)))              # (B, F, Tc, d_c)
    vc = f32(jnp.transpose(cache[:, d_c:], (0, 2, 3, 1)))              # (B, F, Tc, d_c)

    grid_spec = pltpu.PrefetchScalarGridSpec(
        num_scalar_prefetch=0,
        grid=(B // bb,),
        in_specs=[
            pl.BlockSpec((bb, F, T, C), lambda i: (i, 0, 0, 0)),
            pl.BlockSpec((bb, F, Tc, d_c), lambda i: (i, 0, 0, 0)),
            pl.BlockSpec((bb, F, Tc, d_c), lambda i: (i, 0, 0, 0)),
            pl.BlockSpec((C, 5 * d_c), lambda i: (0, 0)),
            pl.BlockSpec((1, 5 * d_c), lambda i: (0, 0)),
            pl.BlockSpec((1, 5 * d_c), lambda i: (0, 0)),
            pl.BlockSpec((d_c, C), lambda i: (0, 0)),
            pl.BlockSpec((1, C), lambda i: (0, 0)),
            pl.BlockSpec((1, C), lambda i: (0, 0)),
        ],
        out_specs=[
            pl.BlockSpec((bb, F, T, C), lambda i: (i, 0, 0, 0)),
            pl.BlockSpec((bb, F, T, 2 * d_c), lambda i: (i, 0, 0, 0)),
        ],
    )

    out, kvnew = pl.pallas_call(
        functools.partial(_asa_kernel, d_c=d_c, bb=bb, F=F, T=T, Tc=Tc),
        out_shape=(jax.ShapeDtypeStruct((B, F, T, C), jnp.float32),
                   jax.ShapeDtypeStruct((B, F, T, 2 * d_c), jnp.float32)),
        grid_spec=grid_spec,
        compiler_params=pltpu.CompilerParams(dimension_semantics=("parallel",)),
    )(x_ftc, kc, vc, f32(w_ft), f32(b_ft), f32(a_ft), f32(wp), f32(bpp), f32(ap))

    out_nchw = jnp.transpose(out, (0, 3, 1, 2))

    # new_cache = [cat(k_cache, kt)[..., 1:] | cat(v_cache, f_out)[..., 1:]]
    #           = [cat(k_cache[..., 1:], kt) | cat(v_cache[..., 1:], f_out)]  (Tc >= 1)
    # Old columns come straight from the NCHW input cache (no transpose); only the
    # fresh T columns produced by the kernel need the channels-first transpose.
    kt_new = jnp.transpose(kvnew[..., :d_c], (0, 3, 1, 2))             # (B, d_c, F, T)
    vo_new = jnp.transpose(kvnew[..., d_c:], (0, 3, 1, 2))             # (B, d_c, F, T)
    new_k = jnp.concatenate([f32(cache[:, :d_c, :, 1:]), kt_new], axis=-1)
    new_v = jnp.concatenate([f32(cache[:, d_c:, :, 1:]), vo_new], axis=-1)
    new_cache = jnp.concatenate([new_k, new_v], axis=1)                # (B, 2*d_c, F, Tc+T-1)
    return out_nchw, new_cache


# ------------------------ pure-JAX NCHW reference ------------------------
def asa_reference(inp, cache, p):
    d_c = inp.shape[1] // 4
    P = jax.lax.Precision.HIGHEST

    def cbp(x, W, g, b, m, v, a):   # conv1x1 (no bias) + BN(eval) + PReLU
        z = jnp.einsum('oi,bift->boft', W, x, precision=P)
        s = g / jnp.sqrt(v + _EPS)
        z = z * s[None, :, None, None] + (b - m * s)[None, :, None, None]
        return jnp.where(z >= 0, z, a[None, :, None, None] * z)

    fqkv = cbp(inp, p['Wf'], p['gf'], p['bf'], p['mf'], p['vf'], p['af'])
    k_cache, v_cache = cache[:, :d_c], cache[:, d_c:]
    B, _, F, T = fqkv.shape
    r = fqkv.reshape(B, d_c, 3, F, T)
    qf, kf, v = r[:, :, 0], r[:, :, 1], r[:, :, 2]
    sc = 1.0 / (d_c ** 0.5)
    f_score = jnp.einsum('bcft,bcyt->btfy', qf, kf, precision=P) * sc
    f_score = jax.nn.softmax(f_score, axis=-1)
    f_out = jnp.einsum('btfy,bcyt->bcft', f_score, v, precision=P)
    f_out = jnp.concatenate([v_cache, f_out], axis=-1)
    new_vcache = f_out[:, :, :, 1:]
    tqk = cbp(inp, p['Wt'], p['gt'], p['bt'], p['mt'], p['vt'], p['at'])
    r = tqk.reshape(B, d_c, 2, F, T)
    qt, kt = r[:, :, 0], r[:, :, 1]
    kt = jnp.concatenate([k_cache, kt], axis=-1)
    new_kcache = kt[:, :, :, 1:]
    t_score = jnp.einsum('bcft,bcfy->bfty', qt, kt, precision=P) * sc
    t_score = jax.nn.softmax(t_score, axis=1)
    t_out = jnp.einsum('bfty,bcfy->bcft', t_score, f_out, precision=P)
    out = cbp(t_out, p['Wp'], p['gp'], p['bp'], p['mp'], p['vp'], p['ap'])
    new_cache = jnp.concatenate([new_kcache, new_vcache], axis=1)
    return out + inp, new_cache


def make_params(key, C):
    d_c = C // 4
    sizes = {'f': 3 * d_c, 't': 2 * d_c, 'p': C}
    in_ch = {'f': C, 't': C, 'p': d_c}
    ki = iter(jax.random.split(key, 18))
    params = {}
    for tag in ('f', 't', 'p'):
        n, cin = sizes[tag], in_ch[tag]
        params['W' + tag] = 0.2 * jax.random.normal(next(ki), (n, cin), jnp.float32)
        params['g' + tag] = 1.0 + 0.1 * jax.random.normal(next(ki), (n,), jnp.float32)
        params['b' + tag] = 0.1 * jax.random.normal(next(ki), (n,), jnp.float32)
        params['m' + tag] = 0.1 * jax.random.normal(next(ki), (n,), jnp.float32)
        params['v' + tag] = 0.8 + 0.4 * jax.random.uniform(next(ki), (n,), jnp.float32)
        params['a' + tag] = 0.25 + 0.05 * jax.random.normal(next(ki), (n,), jnp.float32)
    return params


if __name__ == "__main__":
    B, C, F, T, Tc = 2, 64, 16, 8, 8          # c=64 (module default), d_c=16
    d_c = C // 4
    key = jax.random.PRNGKey(0)
    k_inp, k_cache, k_par = jax.random.split(key, 3)
    inp = jax.random.normal(k_inp, (B, C, F, T), jnp.float32)
    cache = 0.5 * jax.random.normal(k_cache, (B, 2 * d_c, F, Tc), jnp.float32)
    params = make_params(k_par, C)

    out, new_cache = asa_pallas(inp, cache, params)
    jax.block_until_ready((out, new_cache))

    ref_out, ref_cache = asa_reference(inp, cache, params)
    err_out = float(jnp.max(jnp.abs(out - ref_out)))
    err_cache = float(jnp.max(jnp.abs(new_cache - ref_cache)))
    if not (err_out < 5e-2 and err_cache < 5e-2):
        raise RuntimeError(f"mismatch: out err={err_out}, cache err={err_cache}")
    print("KERNEL_OK")
</pallas_src>

<mosaic_0001>
module attributes {stable_mosaic.version = 11 : i64} {
  func.func @_asa_kernel(%arg0: i32, %arg1: memref<1x16x8x64xf32, #tpu.memory_space<vmem>>, %arg2: memref<1x16x8x16xf32, #tpu.memory_space<vmem>>, %arg3: memref<1x16x8x16xf32, #tpu.memory_space<vmem>>, %arg4: memref<64x80xf32, #tpu.memory_space<vmem>>, %arg5: memref<1x80xf32, #tpu.memory_space<vmem>>, %arg6: memref<1x80xf32, #tpu.memory_space<vmem>>, %arg7: memref<16x64xf32, #tpu.memory_space<vmem>>, %arg8: memref<1x64xf32, #tpu.memory_space<vmem>>, %arg9: memref<1x64xf32, #tpu.memory_space<vmem>>, %arg10: memref<1x16x8x64xf32, #tpu.memory_space<vmem>>, %arg11: memref<1x16x8x32xf32, #tpu.memory_space<vmem>>) attributes {dimension_semantics = [#tpu.dimension_semantics<parallel>], iteration_bounds = array<i64: 2>, scalar_prefetch = 0 : i64, scratch_operands = 0 : i64, tpu.core_type = #tpu.core_type<tc>, window_params = [{transform_indices = @transform_0, window_bounds = array<i64: 1, 16, 8, 64>}, {transform_indices = @transform_1, window_bounds = array<i64: 1, 16, 8, 16>}, {transform_indices = @transform_2, window_bounds = array<i64: 1, 16, 8, 16>}, {pipeline_mode = #tpu.pipeline_mode<synchronous>, transform_indices = @transform_3, window_bounds = array<i64: 64, 80>}, {pipeline_mode = #tpu.pipeline_mode<synchronous>, transform_indices = @transform_4, window_bounds = array<i64: 1, 80>}, {pipeline_mode = #tpu.pipeline_mode<synchronous>, transform_indices = @transform_5, window_bounds = array<i64: 1, 80>}, {pipeline_mode = #tpu.pipeline_mode<synchronous>, transform_indices = @transform_6, window_bounds = array<i64: 16, 64>}, {pipeline_mode = #tpu.pipeline_mode<synchronous>, transform_indices = @transform_7, window_bounds = array<i64: 1, 64>}, {pipeline_mode = #tpu.pipeline_mode<synchronous>, transform_indices = @transform_8, window_bounds = array<i64: 1, 64>}, {transform_indices = @transform_9, window_bounds = array<i64: 1, 16, 8, 64>}, {transform_indices = @transform_10, window_bounds = array<i64: 1, 16, 8, 32>}]} {
    %c0 = arith.constant 0 : index
    %c0_0 = arith.constant 0 : index
    %c0_1 = arith.constant 0 : index
    %c0_2 = arith.constant 0 : index
    %0 = vector.load %arg1[%c0, %c0_0, %c0_1, %c0_2] : memref<1x16x8x64xf32, #tpu.memory_space<vmem>>, vector<1x16x8x64xf32>
    %1 = vector.shape_cast %0 : vector<1x16x8x64xf32> to vector<128x64xf32>
    %c0_3 = arith.constant 0 : index
    %c0_4 = arith.constant 0 : index
    %2 = vector.load %arg4[%c0_3, %c0_4] : memref<64x80xf32, #tpu.memory_space<vmem>>, vector<64x80xf32>
    %cst = arith.constant dense<0.000000e+00> : vector<128x80xf32>
    %3 = tpu.matmul %1, %2, %cst {dimension_numbers = #tpu.dot_dimension_numbers<[1], [0], [0], [1], [0, 0, 1, 1], [], []>} : vector<128x64xf32>, vector<64x80xf32>, vector<128x80xf32> -> vector<128x80xf32>
    %c0_5 = arith.constant 0 : index
    %c0_6 = arith.constant 0 : index
    %4 = vector.load %arg5[%c0_5, %c0_6] : memref<1x80xf32, #tpu.memory_space<vmem>>, vector<1x80xf32>
    %5 = vector.shape_cast %4 : vector<1x80xf32> to vector<80xf32>
    %6 = vector.shape_cast %5 : vector<80xf32> to vector<1x80xf32>
    %7 = vector.broadcast %6 : vector<1x80xf32> to vector<128x80xf32>
    %8 = arith.addf %3, %7 : vector<128x80xf32>
    %c0_7 = arith.constant 0 : index
    %c0_8 = arith.constant 0 : index
    %9 = vector.load %arg6[%c0_7, %c0_8] : memref<1x80xf32, #tpu.memory_space<vmem>>, vector<1x80xf32>
    %10 = vector.shape_cast %9 : vector<1x80xf32> to vector<80xf32>
    %cst_9 = arith.constant 0.000000e+00 : f32
    %11 = vector.broadcast %cst_9 : f32 to vector<128x80xf32>
    %12 = arith.cmpf oge, %8, %11 : vector<128x80xf32>
    %13 = vector.shape_cast %10 : vector<80xf32> to vector<1x80xf32>
    %14 = vector.broadcast %13 : vector<1x80xf32> to vector<128x80xf32>
    %15 = arith.mulf %14, %8 : vector<128x80xf32>
    %16 = arith.select %12, %8, %15 : vector<128x80xi1>, vector<128x80xf32>
    %17 = tpu.iota {dimensions = array<i32: 0>} : vector<128x128xi32>
    %c8_i32 = arith.constant 8 : i32
    %c0_i32 = arith.constant 0 : i32
    %18 = arith.cmpi eq, %c8_i32, %c0_i32 : i32
    %c1_i32 = arith.constant 1 : i32
    %19 = arith.select %18, %c1_i32, %c8_i32 : i32
    %20 = vector.broadcast %19 : i32 to vector<128x128xi32>
    %21 = arith.remsi %17, %20 : vector<128x128xi32>
    %c0_i32_10 = arith.constant 0 : i32
    %22 = vector.broadcast %c0_i32_10 : i32 to vector<128x128xi32>
    %23 = arith.cmpi ne, %21, %22 : vector<128x128xi32>
    %c0_i32_11 = arith.constant 0 : i32
    %24 = vector.broadcast %c0_i32_11 : i32 to vector<128x128xi32>
    %25 = arith.cmpi slt, %21, %24 : vector<128x128xi32>
    %c0_i32_12 = arith.constant 0 : i32
    %26 = arith.cmpi slt, %19, %c0_i32_12 : i32
    %27 = vector.broadcast %26 : i1 to vector<128x128xi1>
    %28 = vector.broadcast %27 : vector<128x128xi1> to vector<128x128xi1>
    %29 = arith.xori %25, %28 : vector<128x128xi1>
    %30 = arith.andi %29, %23 : vector<128x128xi1>
    %31 = vector.broadcast %19 : i32 to vector<128x128xi32>
    %32 = arith.addi %21, %31 : vector<128x128xi32>
    %33 = arith.select %30, %32, %21 : vector<128x128xi1>, vector<128x128xi32>
    %34 = tpu.iota {dimensions = array<i32: 1>} : vector<128x128xi32>
    %c8_i32_13 = arith.constant 8 : i32
    %c0_i32_14 = arith.constant 0 : i32
    %35 = arith.cmpi eq, %c8_i32_13, %c0_i32_14 : i32
    %c1_i32_15 = arith.constant 1 : i32
    %36 = arith.select %35, %c1_i32_15, %c8_i32_13 : i32
    %37 = vector.broadcast %36 : i32 to vector<128x128xi32>
    %38 = arith.remsi %34, %37 : vector<128x128xi32>
    %c0_i32_16 = arith.constant 0 : i32
    %39 = vector.broadcast %c0_i32_16 : i32 to vector<128x128xi32>
    %40 = arith.cmpi ne, %38, %39 : vector<128x128xi32>
    %c0_i32_17 = arith.constant 0 : i32
    %41 = vector.broadcast %c0_i32_17 : i32 to vector<128x128xi32>
    %42 = arith.cmpi slt, %38, %41 : vector<128x128xi32>
    %c0_i32_18 = arith.constant 0 : i32
    %43 = arith.cmpi slt, %36, %c0_i32_18 : i32
    %44 = vector.broadcast %43 : i1 to vector<128x128xi1>
    %45 = vector.broadcast %44 : vector<128x128xi1> to vector<128x128xi1>
    %46 = arith.xori %42, %45 : vector<128x128xi1>
    %47 = arith.andi %46, %40 : vector<128x128xi1>
    %48 = vector.broadcast %36 : i32 to vector<128x128xi32>
    %49 = arith.addi %38, %48 : vector<128x128xi32>
    %50 = arith.select %47, %49, %38 : vector<128x128xi1>, vector<128x128xi32>
    %51 = arith.cmpi eq, %33, %50 : vector<128x128xi32>
    %52 = vector.extract_strided_slice %16 {offsets = [0, 0], sizes = [128, 16], strides = [1, 1]} : vector<128x80xf32> to vector<128x16xf32>
    %53 = vector.extract_strided_slice %16 {offsets = [0, 16], sizes = [128, 16], strides = [1, 1]} : vector<128x80xf32> to vector<128x16xf32>
    %54 = vector.extract_strided_slice %16 {offsets = [0, 32], sizes = [128, 16], strides = [1, 1]} : vector<128x80xf32> to vector<128x16xf32>
    %55 = vector.extract_strided_slice %16 {offsets = [0, 48], sizes = [128, 16], strides = [1, 1]} : vector<128x80xf32> to vector<128x16xf32>
    %56 = vector.shape_cast %55 : vector<128x16xf32> to vector<16x8x16xf32>
    %57 = vector.extract_strided_slice %16 {offsets = [0, 64], sizes = [128, 16], strides = [1, 1]} : vector<128x80xf32> to vector<128x16xf32>
    %58 = vector.shape_cast %57 : vector<128x16xf32> to vector<16x8x16xf32>
    "tpu.trace_start"() <{level = 10 : i32, message = "ic,jc->ij"}> : () -> ()
    %cst_19 = arith.constant dense<0.000000e+00> : vector<128x128xf32>
    %59 = tpu.matmul %52, %53, %cst_19 {dimension_numbers = #tpu.dot_dimension_numbers<[1], [1], [0], [0], [0, 0, 1, 0], [], []>} : vector<128x16xf32>, vector<128x16xf32>, vector<128x128xf32> -> vector<128x128xf32>
    "tpu.trace_stop"() : () -> ()
    %cst_20 = arith.constant 2.500000e-01 : f32
    %60 = vector.broadcast %cst_20 : f32 to vector<128x128xf32>
    %61 = arith.mulf %59, %60 : vector<128x128xf32>
    %cst_21 = arith.constant -1.000000e+30 : f32
    %62 = vector.broadcast %cst_21 : f32 to vector<128x128xf32>
    %63 = arith.select %51, %61, %62 : vector<128x128xi1>, vector<128x128xf32>
    %cst_22 = arith.constant dense<0xFF800000> : vector<128xf32>
    %64 = vector.multi_reduction <maximumf>, %63, %cst_22 [1] : vector<128x128xf32> to vector<128xf32>
    %65 = vector.shape_cast %64 : vector<128xf32> to vector<128x1xf32>
    %66 = vector.broadcast %65 : vector<128x1xf32> to vector<128x128xf32>
    %67 = arith.subf %63, %66 : vector<128x128xf32>
    %68 = math.exp %67 : vector<128x128xf32>
    %cst_23 = arith.constant dense<0.000000e+00> : vector<128xf32>
    %69 = vector.multi_reduction <add>, %68, %cst_23 [1] : vector<128x128xf32> to vector<128xf32>
    %70 = vector.shape_cast %69 : vector<128xf32> to vector<128x1xf32>
    %71 = tpu.reciprocal %70 {approx = true} : vector<128x1xf32> -> vector<128x1xf32>
    %72 = vector.broadcast %71 : vector<128x1xf32> to vector<128x128xf32>
    %73 = arith.mulf %68, %72 : vector<128x128xf32>
    %cst_24 = arith.constant dense<0.000000e+00> : vector<128x16xf32>
    %74 = tpu.matmul %73, %54, %cst_24 {dimension_numbers = #tpu.dot_dimension_numbers<[1], [0], [0], [1], [0, 0, 1, 1], [], []>} : vector<128x128xf32>, vector<128x16xf32>, vector<128x16xf32> -> vector<128x16xf32>
    %75 = vector.shape_cast %74 : vector<128x16xf32> to vector<16x8x16xf32>
    %c0_25 = arith.constant 0 : index
    %c0_26 = arith.constant 0 : index
    %c0_27 = arith.constant 0 : index
    %c0_28 = arith.constant 0 : index
    %76 = vector.load %arg2[%c0_25, %c0_26, %c0_27, %c0_28] : memref<1x16x8x16xf32, #tpu.memory_space<vmem>>, vector<1x16x8x16xf32>
    %77 = vector.shape_cast %76 : vector<1x16x8x16xf32> to vector<16x8x16xf32>
    %78 = tpu.concatenate %77, %58 in 1 : vector<16x8x16xf32>, vector<16x8x16xf32> -> vector<16x16x16xf32>
    %c0_29 = arith.constant 0 : index
    %c0_30 = arith.constant 0 : index
    %c0_31 = arith.constant 0 : index
    %c0_32 = arith.constant 0 : index
    %79 = vector.load %arg3[%c0_29, %c0_30, %c0_31, %c0_32] : memref<1x16x8x16xf32, #tpu.memory_space<vmem>>, vector<1x16x8x16xf32>
    %80 = vector.shape_cast %79 : vector<1x16x8x16xf32> to vector<16x8x16xf32>
    %81 = tpu.concatenate %80, %75 in 1 : vector<16x8x16xf32>, vector<16x8x16xf32> -> vector<16x16x16xf32>
    "tpu.trace_start"() <{level = 10 : i32, message = "ftc,fyc->fty"}> : () -> ()
    %cst_33 = arith.constant dense<0.000000e+00> : vector<16x8x16xf32>
    %82 = tpu.matmul %56, %78, %cst_33 {dimension_numbers = #tpu.dot_dimension_numbers<[2], [2], [1], [1], [0, 0, 0, 1, 1, 1], [0], [0]>} : vector<16x8x16xf32>, vector<16x16x16xf32>, vector<16x8x16xf32> -> vector<16x8x16xf32>
    "tpu.trace_stop"() : () -> ()
    %cst_34 = arith.constant 2.500000e-01 : f32
    %83 = vector.broadcast %cst_34 : f32 to vector<16x8x16xf32>
    %84 = arith.mulf %82, %83 : vector<16x8x16xf32>
    %cst_35 = arith.constant dense<0xFF800000> : vector<8x16xf32>
    %85 = vector.multi_reduction <maximumf>, %84, %cst_35 [0] : vector<16x8x16xf32> to vector<8x16xf32>
    %86 = vector.shape_cast %85 : vector<8x16xf32> to vector<1x8x16xf32>
    %87 = vector.broadcast %86 : vector<1x8x16xf32> to vector<16x8x16xf32>
    %88 = arith.subf %84, %87 : vector<16x8x16xf32>
    %89 = math.exp %88 : vector<16x8x16xf32>
    %cst_36 = arith.constant dense<0.000000e+00> : vector<8x16xf32>
    %90 = vector.multi_reduction <add>, %89, %cst_36 [0] : vector<16x8x16xf32> to vector<8x16xf32>
    %91 = vector.shape_cast %90 : vector<8x16xf32> to vector<1x8x16xf32>
    %92 = tpu.reciprocal %91 {approx = true} : vector<1x8x16xf32> -> vector<1x8x16xf32>
    %93 = vector.broadcast %92 : vector<1x8x16xf32> to vector<16x8x16xf32>
    %94 = arith.mulf %89, %93 : vector<16x8x16xf32>
    "tpu.trace_start"() <{level = 10 : i32, message = "fty,fyc->ftc"}> : () -> ()
    %cst_37 = arith.constant dense<0.000000e+00> : vector<16x8x16xf32>
    %95 = tpu.matmul %94, %81, %cst_37 {dimension_numbers = #tpu.dot_dimension_numbers<[2], [1], [1], [2], [0, 0, 0, 1, 1, 2], [0], [0]>} : vector<16x8x16xf32>, vector<16x16x16xf32>, vector<16x8x16xf32> -> vector<16x8x16xf32>
    "tpu.trace_stop"() : () -> ()
    %96 = vector.shape_cast %95 : vector<16x8x16xf32> to vector<128x16xf32>
    %97 = tpu.concatenate %58, %75 in 2 : vector<16x8x16xf32>, vector<16x8x16xf32> -> vector<16x8x32xf32>
    %98 = vector.shape_cast %97 : vector<16x8x32xf32> to vector<1x16x8x32xf32>
    %c0_38 = arith.constant 0 : index
    %c0_39 = arith.constant 0 : index
    %99 = vector.load %arg7[%c0_38, %c0_39] : memref<16x64xf32, #tpu.memory_space<vmem>>, vector<16x64xf32>
    %cst_40 = arith.constant dense<0.000000e+00> : vector<128x64xf32>
    %100 = tpu.matmul %96, %99, %cst_40 {dimension_numbers = #tpu.dot_dimension_numbers<[1], [0], [0], [1], [0, 0, 1, 1], [], []>} : vector<128x16xf32>, vector<16x64xf32>, vector<128x64xf32> -> vector<128x64xf32>
    %c0_41 = arith.constant 0 : index
    %c0_42 = arith.constant 0 : index
    %101 = vector.load %arg8[%c0_41, %c0_42] : memref<1x64xf32, #tpu.memory_space<vmem>>, vector<1x64xf32>
    %102 = vector.shape_cast %101 : vector<1x64xf32> to vector<64xf32>
    %103 = vector.shape_cast %102 : vector<64xf32> to vector<1x64xf32>
    %104 = vector.broadcast %103 : vector<1x64xf32> to vector<128x64xf32>
    %105 = arith.addf %100, %104 : vector<128x64xf32>
    %c0_43 = arith.constant 0 : index
    %c0_44 = arith.constant 0 : index
    %106 = vector.load %arg9[%c0_43, %c0_44] : memref<1x64xf32, #tpu.memory_space<vmem>>, vector<1x64xf32>
    %107 = vector.shape_cast %106 : vector<1x64xf32> to vector<64xf32>
    %cst_45 = arith.constant 0.000000e+00 : f32
    %108 = vector.broadcast %cst_45 : f32 to vector<128x64xf32>
    %109 = arith.cmpf oge, %105, %108 : vector<128x64xf32>
    %110 = vector.shape_cast %107 : vector<64xf32> to vector<1x64xf32>
    %111 = vector.broadcast %110 : vector<1x64xf32> to vector<128x64xf32>
    %112 = arith.mulf %111, %105 : vector<128x64xf32>
    %113 = arith.select %109, %105, %112 : vector<128x64xi1>, vector<128x64xf32>
    %114 = arith.addf %113, %1 : vector<128x64xf32>
    %115 = vector.shape_cast %114 : vector<128x64xf32> to vector<1x16x8x64xf32>
    %c0_46 = arith.constant 0 : index
    %c0_47 = arith.constant 0 : index
    %c0_48 = arith.constant 0 : index
    %c0_49 = arith.constant 0 : index
    %116 = vector.load %arg10[%c0_46, %c0_47, %c0_48, %c0_49] : memref<1x16x8x64xf32, #tpu.memory_space<vmem>>, vector<1x16x8x64xf32>
    tpu.vector_store %arg10[%c0_46, %c0_47, %c0_48, %c0_49], %115 {strides = array<i32>} : memref<1x16x8x64xf32, #tpu.memory_space<vmem>>, vector<1x16x8x64xf32>,
    %c0_50 = arith.constant 0 : index
    %c0_51 = arith.constant 0 : index
    %c0_52 = arith.constant 0 : index
    %c0_53 = arith.constant 0 : index
    %117 = vector.load %arg11[%c0_50, %c0_51, %c0_52, %c0_53] : memref<1x16x8x32xf32, #tpu.memory_space<vmem>>, vector<1x16x8x32xf32>
    tpu.vector_store %arg11[%c0_50, %c0_51, %c0_52, %c0_53], %98 {strides = array<i32>} : memref<1x16x8x32xf32, #tpu.memory_space<vmem>>, vector<1x16x8x32xf32>,
    return
  }
  func.func @transform_0(%arg0: i32) -> (i32, i32, i32, i32) {
    %c0_i32 = arith.constant 0 : i32
    %c0_i32_0 = arith.constant 0 : i32
    %c0_i32_1 = arith.constant 0 : i32
    %c0_i32_2 = arith.constant 0 : i32
    return %arg0, %c0_i32, %c0_i32_0, %c0_i32_1 : i32, i32, i32, i32
  }
  func.func @transform_1(%arg0: i32) -> (i32, i32, i32, i32) {
    %c0_i32 = arith.constant 0 : i32
    %c0_i32_0 = arith.constant 0 : i32
    %c0_i32_1 = arith.constant 0 : i32
    %c0_i32_2 = arith.constant 0 : i32
    return %arg0, %c0_i32, %c0_i32_0, %c0_i32_1 : i32, i32, i32, i32
  }
  func.func @transform_2(%arg0: i32) -> (i32, i32, i32, i32) {
    %c0_i32 = arith.constant 0 : i32
    %c0_i32_0 = arith.constant 0 : i32
    %c0_i32_1 = arith.constant 0 : i32
    %c0_i32_2 = arith.constant 0 : i32
    return %arg0, %c0_i32, %c0_i32_0, %c0_i32_1 : i32, i32, i32, i32
  }
  func.func @transform_3(%arg0: i32) -> (i32, i32) {
    %c0_i32 = arith.constant 0 : i32
    %c0_i32_0 = arith.constant 0 : i32
    %c0_i32_1 = arith.constant 0 : i32
    return %c0_i32, %c0_i32_0 : i32, i32
  }
  func.func @transform_4(%arg0: i32) -> (i32, i32) {
    %c0_i32 = arith.constant 0 : i32
    %c0_i32_0 = arith.constant 0 : i32
    %c0_i32_1 = arith.constant 0 : i32
    return %c0_i32, %c0_i32_0 : i32, i32
  }
  func.func @transform_5(%arg0: i32) -> (i32, i32) {
    %c0_i32 = arith.constant 0 : i32
    %c0_i32_0 = arith.constant 0 : i32
    %c0_i32_1 = arith.constant 0 : i32
    return %c0_i32, %c0_i32_0 : i32, i32
  }
  func.func @transform_6(%arg0: i32) -> (i32, i32) {
    %c0_i32 = arith.constant 0 : i32
    %c0_i32_0 = arith.constant 0 : i32
    %c0_i32_1 = arith.constant 0 : i32
    return %c0_i32, %c0_i32_0 : i32, i32
  }
  func.func @transform_7(%arg0: i32) -> (i32, i32) {
    %c0_i32 = arith.constant 0 : i32
    %c0_i32_0 = arith.constant 0 : i32
    %c0_i32_1 = arith.constant 0 : i32
    return %c0_i32, %c0_i32_0 : i32, i32
  }
  func.func @transform_8(%arg0: i32) -> (i32, i32) {
    %c0_i32 = arith.constant 0 : i32
    %c0_i32_0 = arith.constant 0 : i32
    %c0_i32_1 = arith.constant 0 : i32
    return %c0_i32, %c0_i32_0 : i32, i32
  }
  func.func @transform_9(%arg0: i32) -> (i32, i32, i32, i32) {
    %c0_i32 = arith.constant 0 : i32
    %c0_i32_0 = arith.constant 0 : i32
    %c0_i32_1 = arith.constant 0 : i32
    %c0_i32_2 = arith.constant 0 : i32
    return %arg0, %c0_i32, %c0_i32_0, %c0_i32_1 : i32, i32, i32, i32
  }
  func.func @transform_10(%arg0: i32) -> (i32, i32, i32, i32) {
    %c0_i32 = arith.constant 0 : i32
    %c0_i32_0 = arith.constant 0 : i32
    %c0_i32_1 = arith.constant 0 : i32
    %c0_i32_2 = arith.constant 0 : i32
    return %arg0, %c0_i32, %c0_i32_0, %c0_i32_1 : i32, i32, i32, i32
  }
}

</mosaic_0001>

<bundles_post_ra>
// kernel: tpu_custom_call.1
= control target key start
LH: loop header
LB: loop body
LE: loop exit
PB: predicated region body
PF: predicated region fallthrough
CT: control target
= control target key end

     0   :  { %s7881_s0 = inlined_call_operand.hbm [shape: f32[2,16,8,64], index: 0, kind: input, shape index: {}]   ;;  %s7882_s1 = inlined_call_operand.hbm [shape: f32[2,16,8,16], index: 1, kind: input, shape index: {}]   ;;  %s7883_s2 = inlined_call_operand.hbm [shape: f32[2,16,8,16], index: 2, kind: input, shape index: {}]   ;;  %s7884_s3 = inlined_call_operand.hbm [shape: f32[64,80], index: 3, kind: input, shape index: {}]   ;;  %s7885_s4 = inlined_call_operand.vmem [shape: f32[1,80], index: 4, kind: input, shape index: {}]   ;;  %s7886_s5 = inlined_call_operand.vmem [shape: f32[1,80], index: 5, kind: input, shape index: {}]   ;;  %s7887_s6 = inlined_call_operand.vmem [shape: f32[16,64], index: 6, kind: input, shape index: {}]   ;;  %s7888_s7 = inlined_call_operand.vmem [shape: f32[1,64], index: 7, kind: input, shape index: {}]   ;;  %s7889_s8 = inlined_call_operand.vmem [shape: f32[1,64], index: 8, kind: input, shape index: {}]   ;;  %s7890_s9 = inlined_call_operand.hbm [shape: f32[2,16,8,64], index: 9, kind: output, shape index: {0}]   ;;  %s7891_s10 = inlined_call_operand.hbm [shape: f32[2,16,8,32], index: 10, kind: output, shape index: {1}]  }
   0x1   :  { %7916 = sst [smem:[#allocation25_spill]] %s7881_s0 }
   0x2   :  { %7917 = sst [smem:[#allocation26_spill]] %s7882_s1 }
   0x3   :  { %7918 = sst [smem:[#allocation27_spill]] %s7888_s7 }
   0x4   :  { %7919 = sst [smem:[#allocation28_spill]] %s7889_s8 }
   0x5   :  { %7920 = sst [smem:[#allocation29_spill]] %s7890_s9 }
   0x6   :  { %7921 = sst [smem:[#allocation30_spill]] %s7891_s10 }
   0x7   :  { %16 = vsyncpa [#allocation3], 0 }
   0x8   :  { %18 = vsyncpa [#allocation3 + $0x1], 0 }
   0x9   :  { %19 = vsyncpa [#allocation6], 0 }
   0xa   :  { %21 = vsyncpa [#allocation6 + $0x1], 0 }
   0xb   :  { %22 = vsyncpa [#allocation9], 0 }
   0xc   :  { %23 = vsyncpa [#allocation4], 0 }
   0xd   :  { %25 = vsyncpa [#allocation4 + $0x1], 0 }
   0xe   :  { %26 = vsyncpa [#allocation12], 0 }
   0xf   :  { %28 = vsyncpa [#allocation12 + $0x1], 0  ;;  %s6421_s13 = smov 0   ;;  %s6423_s14 = smov 0  }
  0x10   :  { %s6425_s15 = smov 0   ;;  %s6427_s16 = smov 0  }
  0x11 LB: > { %7922 = sst [smem:[#allocation18_spill]] %s6334_s13  ;;  %s6442_s17 = sadd.s32 1, %s6346_s16   ;;  %s6346_s16 = sphi %s6427_s16, %s7963_s16   ;;  %s6342_s15 = sphi %s6425_s15, %s7965_s15   ;;  %s6338_s14 = sphi %s6423_s14, %s7967_s14   ;;  %s6334_s13 = sphi %s6421_s13, %s7966_s13  }
  0x12   : > { %7923 = sst [smem:[#allocation19_spill]] %s6342_s15  ;;  %s41_s18 = sadd.s32 1, %s6342_s15 }
  0x13   : > { %7924 = sst [smem:[#allocation20_spill]] %s6346_s16  ;;  %s38_s19 = ssub.s32 %s6346_s16, %s6442_s17 }
  0x14   : > { %7925 = sst [smem:[#allocation21_spill]] %s6442_s17  ;;  %p7893_p0 = scmp.ne.s32.totalorder %s6342_s15, %s6338_s14 }
  0x15   : > { %p39_p1 = scmp.eq.s32.totalorder %s38_s19, 0  ;;  %p49_p2 = scmp.eq.s32.totalorder %s6346_s16, 0 }
  0x16   : > { %p5880_p5 = scmp.lt.s32.totalorder %s6346_s16, 2  ;;  %s7892_s21 = sand.u32 1, %s6342_s15  }
  0x17   : > { %s6451_s20 = scalar_select %p39_p1, %s6342_s15, %s41_s18  }
  0x18   : > { %p50_p3 = por %p49_p2, %p7893_p0  ;;  %s6461_s22 = sshll.u32 %s7892_s21, 7 }
  0x19   : > { %7926 = sst [smem:[#allocation22_spill]] %s6451_s20  ;;  %s6464_s23 = sshll.u32 %s6346_s16, 11 }
  0x1a   : > { %p6466_p6 = pnand %p5880_p5, %p50_p3  ;;  %s357_s25 = sand.u32 1, %s6346_s16  }
  0x1b   : > { %s7928_s1 = sld [smem:[#allocation26_spill]]  ;;  %s361_s29 = scalar_lea.vmem [#allocation5], %s6461_s22 }
  0x1c   : > { %s7927_s24 = scalar_select %p6466_p6, 1, 0 }
  0x1d   : > { %s368_s30 = sshll.u32 %s361_s29, 4  ;;  %s6480_s11 = scalar_lea.sflag [#allocation6], %s357_s25  ;;  %s6478_s30 = int_to_ptr.vmem [resolvable:$true] %s368_s30 }
  0x1e   : > { %p6486_p8 = pneg %p6466_p6 }
  0x20   : > { %s7929_s18 = scalar_select %p6486_p8, 1, 0 }
  0x21   : > { %s6475_s28 = scalar_lea.hbm %s7928_s1, %s6464_s23  ;;  %s6127_s27 = scalar_lea.hbm %s7928_s1, 4096 }
  0x22   : > { %s6122_s12 = scalar_lea.hbm %s6475_s28, 2048  ;;  %p6128_p11 = scmp.lt.u32.totalorder %s6475_s28, %s7928_s1 }
  0x23   : > { %p6123_p7 = scmp.ne.s32.totalorder %s6475_s28, %s6122_s12  ;;  %p6129_p12 = scmp.lt.u32.totalorder %s6127_s27, %s6122_s12 }
  0x24   : > { %p6131_p1 = scmp.lt.u32.totalorder %s6122_s12, %s6475_s28 }
  0x25   : > { %p6125_p9 = pnand %p6486_p8, %p6123_p7  ;;  %p6130_p13 = por %p6129_p12, %p6128_p11 }
  0x27   : > { %p6126_p10 = pneg %p6125_p9  ;;  %p6132_p2 = por %p6131_p1, %p6130_p13 }
  0x29   : > { %p6133_p3 = pnand %p6132_p2, %p6126_p10 }
  0x2b   : > { %6136 = shalt.err (!%p6133_p3)
}
  0x2c   : > { %s6137_s25 = scalar_lea.vmem %s6478_s30, 2048  ;;  %s6348_s19 = smov [#allocation5]  }
  0x2d   : > { %p6138_p5 = scmp.ne.s32.totalorder %s6478_s30, %s6137_s25  ;;  %s6142_s26 = sshll.u32 %s6348_s19, 4  ;;  %s6143_s26 = int_to_ptr.vmem [resolvable:$false] %s6142_s26 }
  0x2e   : > { %s6144_s21 = scalar_lea.vmem %s6143_s26, 4096  ;;  %p6145_p4 = scmp.lt.s32.totalorder %s6478_s30, %s6143_s26 }
  0x2f   : > { %p6140_p7 = pnand %p6138_p5, %p6486_p8  ;;  %p6146_p0 = scmp.lt.s32.totalorder %s6144_s21, %s6137_s25 }
  0x31   : > { %p6141_p9 = pneg %p6140_p7  ;;  %p6147_p11 = por %p6146_p0, %p6145_p4 }
  0x33   : > { %p6148_p12 = pnand %p6147_p11, %p6141_p9 }
  0x35   : > { %6151 = shalt.err (!%p6148_p12)
}
  0x36   : > { %s7894_s12 = smov 128   ;;  %s7896_s27 = smov 8  }
  0x37   : > { %5868 = dma.hbm_to_vmem [thread:$0]  (!%p6466_p6), %s6475_s28, 2048, %s6478_s30, %s6480_s11, %s7894_s12, %s7894_s12, %s7896_s27  }
  0x38   : > { %s6514_s29 = sadd.s32 4294967295, %s6346_s16   ;;  %s4861_s25 = sadd.s32 4294967294, %s6346_s16  }
  0x39   : > { %p54_p0 = scmp.ne.s32.totalorder %s6338_s14, %s6334_s13  ;;  %p7904_p4 = scmp.eq.s32.totalorder %s6514_s29, 0 }
  0x3a   : > { %p256_p10 = scmp.eq.s32.totalorder %s6514_s29, 1  ;;  %p262_p13 = scmp.eq.s32.totalorder %s4861_s25, 1 }
  0x3b   : > { %p6523_p1 = por %p7904_p4, %p54_p0  ;;  %p4862_p2 = scmp.ge.s32.totalorder %s6346_s16, 1 }
  0x3c   : > { %p7931_p3 = scmp.ne.s32.totalorder %s6342_s15, %s6338_s14  ;;  %p6535_p7 = por %p262_p13, %p54_p0 }
  0x3d   : > { %s7930_s19 = scalar_select %p6523_p1, 1, 0 }
  0x3e   : > { %p6531_p5 = por %p256_p10, %p7931_p3  ;;  %p295_p9 = scmp.lt.s32.totalorder %s6346_s16, 3 }
  0x3f   : > { %s7934_s30 = scalar_select %p6535_p7, 1, 0 }
  0x40   : > { %s7932_s28 = scalar_select %p6531_p5, 1, 0 }
  0x41   : > { %7935 = sst [smem:[#allocation24_spill]] %s7934_s30  ;;  %p6540_p11 = pnand %p4862_p2, %p295_p9 }
  0x42   : > { %7933 = sst [smem:[#allocation23_spill]] %s7932_s28  ;;  %s6351_s21 = smov [#allocation8]  }
  0x43   : > { %s7936_s26 = scalar_select %p6540_p11, 1, 0 }
  0x44   : > { %s307_s25 = sshll.u32 %s6351_s21, 4  ;;  %p5858_p12 = pneg %p6540_p11  ;;  %s6544_s25 = int_to_ptr.vmem [resolvable:$true] %s307_s25 }
  0x45   : > { %s7937_s0 = sld [smem:[#allocation25_spill]]  ;;  %s340_s20 = scalar_lea.vmem [#allocation2], %s6461_s22 }
  0x46   : > { %s347_s17 = sshll.u32 %s340_s20, 4  ;;  %p6557_p0 = pnand %p5858_p12, %p7904_p4  ;;  %s6561_s17 = int_to_ptr.vmem [resolvable:$true] %s347_s17 }
  0x47   : > { %s7939_s21 = sand.u32 1, %s6342_s15  }
  0x48   : > { %s7938_s16 = scalar_select %p6557_p0, 1, 0 }
  0x49   : > { %s6565_s30 = scalar_lea.sflag [#allocation3], %s7939_s21 }
  0x4b   : > { %s6552_s1 = scalar_lea.hbm %s7937_s0, %s6464_s23  ;;  %s6157_s9 = scalar_lea.hbm %s7937_s0, 4096 }
  0x4c   : > { %s6152_s13 = scalar_lea.hbm %s6552_s1, 2048  ;;  %p6158_p3 = scmp.lt.u32.totalorder %s6552_s1, %s7937_s0 }
  0x4d   : > { %p6153_p10 = scmp.ne.s32.totalorder %s6552_s1, %s6152_s13  ;;  %p6159_p9 = scmp.lt.u32.totalorder %s6157_s9, %s6152_s13 }
  0x4e   : > { %p6161_p4 = scmp.lt.u32.totalorder %s6152_s13, %s6552_s1 }
  0x4f   : > { %p6155_p13 = pnand %p6153_p10, %p6486_p8  ;;  %p6160_p12 = por %p6159_p9, %p6158_p3 }
  0x51   : > { %p6156_p2 = pneg %p6155_p13  ;;  %p6162_p7 = por %p6161_p4, %p6160_p12 }
  0x53   : > { %p6163_p5 = pnand %p6162_p7, %p6156_p2 }
  0x55   : > { %6166 = shalt.err (!%p6163_p5)
}
  0x56   : > { %s6167_s21 = scalar_lea.vmem %s6561_s17, 2048  ;;  %s6352_s12 = smov [#allocation2]  }
  0x57   : > { %p6168_p10 = scmp.ne.s32.totalorder %s6561_s17, %s6167_s21  ;;  %s6172_s27 = sshll.u32 %s6352_s12, 4  ;;  %s6173_s27 = int_to_ptr.vmem [resolvable:$false] %s6172_s27 }
  0x58   : > { %s6174_s8 = scalar_lea.vmem %s6173_s27, 4096  ;;  %p6175_p11 = scmp.lt.s32.totalorder %s6561_s17, %s6173_s27 }
  0x59   : > { %p6170_p13 = pnand %p6168_p10, %p6486_p8  ;;  %p6176_p0 = scmp.lt.s32.totalorder %s6174_s8, %s6167_s21 }
  0x5b   : > { %p6171_p1 = pneg %p6170_p13  ;;  %p6177_p3 = por %p6176_p0, %p6175_p11 }
  0x5d   : > { %p6178_p9 = pnand %p6177_p3, %p6171_p1 }
  0x5f   : > { %6181 = shalt.err (!%p6178_p9)
}
  0x60   : > { %s7940_s9 = smov 8   ;;  %s7941_s13 = smov 128  }
  0x61   : > { %5865 = dma.hbm_to_vmem [thread:$0]  (!%p6466_p6), %s6552_s1, 2048, %s6561_s17, %s6565_s30, %s7941_s13, %s7941_s13, %s7940_s9  }
  0x62   : > { %s6596_s0 = scalar_lea.hbm %s7883_s2, %s6464_s23  ;;  %s6182_s8 = scalar_lea.hbm %s7884_s3, 1024 }
  0x63   : > { %p6183_p4 = scmp.ne.s32.totalorder %s7884_s3, %s6182_s8  ;;  %p7942_p1 = scmp.ne.s32.totalorder %s7938_s16, 0 }
  0x64   : > { %p6189_p0 = scmp.lt.u32.totalorder %s6182_s8, %s7884_s3 }
  0x65   : > { %p6184_p5 = pneg %p7942_p1 }
  0x67   : > { %p6185_p7 = pnand %p6184_p5, %p6183_p4 }
  0x69   : > { %p6186_p11 = pneg %p6185_p7 }
  0x6b   : > { %p6191_p2 = pnand %p6189_p0, %p6186_p11 }
  0x6d   : > { %6194 = shalt.err (!%p6191_p2)
}
  0x6e   : > { %s6195_s1 = scalar_lea.vmem %s6544_s25, 1024  ;;  %p6203_p3 = scmp.lt.s32.totalorder %s6544_s25, %s6544_s25 }
  0x6f   : > { %p6196_p12 = scmp.ne.s32.totalorder %s6544_s25, %s6195_s1  ;;  %p6204_p9 = scmp.lt.s32.totalorder %s6195_s1, %s6195_s1 }
  0x71   : > { %p6198_p10 = pnand %p6196_p12, %p6184_p5  ;;  %p6205_p6 = por %p6204_p9, %p6203_p3 }
  0x73   : > { %p6199_p13 = pneg %p6198_p10 }
  0x75   : > { %p6206_p8 = pnand %p6205_p6, %p6199_p13 }
  0x77   : > { %6209 = shalt.err (!%p6206_p8)
}
  0x78   : > { %5861 = dma.hbm_to_vmem [thread:$0]  (!%p7942_p1), %s7884_s3, 1024, %s6544_s25, [#allocation9], %s7941_s13, %s7941_s13, %s7940_s9  }
  0x79   : > { %s382_s15 = scalar_lea.vmem [#allocation7], %s6461_s22  ;;  %s6210_s23 = scalar_lea.hbm %s6596_s0, 2048 }
  0x7a   : > { %s389_s17 = sshll.u32 %s382_s15, 4  ;;  %p6211_p6 = scmp.ne.s32.totalorder %s6596_s0, %s6210_s23  ;;  %s6623_s17 = int_to_ptr.vmem [resolvable:$true] %s389_s17 }
  0x7b   : > { %p7943_p8 = scmp.ne.s32.totalorder %s7929_s18, 0  ;;  %s6215_s30 = scalar_lea.hbm %s7883_s2, 4096 }
  0x7c   : > { %p6216_p7 = scmp.lt.u32.totalorder %s6596_s0, %s7883_s2  ;;  %p6217_p11 = scmp.lt.u32.totalorder %s6215_s30, %s6210_s23 }
  0x7d   : > { %p6213_p4 = pnand %p6211_p6, %p7943_p8  ;;  %p6219_p1 = scmp.lt.u32.totalorder %s6210_s23, %s6596_s0 }
  0x7e   : > { %p6218_p0 = por %p6217_p11, %p6216_p7 }
  0x7f   : > { %p6214_p5 = pneg %p6213_p4 }
  0x80   : > { %p6220_p2 = por %p6219_p1, %p6218_p0 }
  0x82   : > { %p6221_p12 = pnand %p6220_p2, %p6214_p5 }
  0x84   : > { %6224 = shalt.err (!%p6221_p12)
}
  0x85   : > { %s6225_s22 = scalar_lea.vmem %s6623_s17, 2048  ;;  %s6353_s25 = smov [#allocation7]  }
  0x86   : > { %p6226_p10 = scmp.ne.s32.totalorder %s6623_s17, %s6225_s22  ;;  %s6230_s21 = sshll.u32 %s6353_s25, 4  ;;  %s6231_s21 = int_to_ptr.vmem [resolvable:$false] %s6230_s21 }
  0x87   : > { %s6232_s27 = scalar_lea.vmem %s6231_s21, 4096  ;;  %p6233_p9 = scmp.lt.s32.totalorder %s6623_s17, %s6231_s21 }
  0x88   : > { %p6228_p13 = pnand %p6226_p10, %p7943_p8  ;;  %p6234_p6 = scmp.lt.s32.totalorder %s6232_s27, %s6225_s22 }
  0x8a   : > { %p6229_p3 = pneg %p6228_p13  ;;  %p6235_p4 = por %p6234_p6, %p6233_p9 }
  0x8c   : > { %p6236_p7 = pnand %p6235_p4, %p6229_p3 }
  0x8e   : > { %6239 = shalt.err (!%p6236_p7)
}
  0x8f   : > { %p7944_p5 = scmp.ne.s32.totalorder %s7927_s24, 0  ;;  %p7945_p8 = scmp.ne.s32.totalorder %s7936_s26, 0 }
  0x90   : > { %s6653_s18 = sand.u32 (!%p7945_p8), 1, %s6338_s14   ;;  %p7946_p11 = scmp.ne.s32.totalorder (!%p7945_p8), %s7930_s19, 0 }
  0x91   : > { %5871 = dma.hbm_to_vmem [thread:$0]  (!%p7944_p5), %s6596_s0, 2048, %s6623_s17, %s6480_s11, %s7941_s13, %s7941_s13, %s7940_s9  }
  0x92   : > { %401 = sbr.rel (%p7945_p8) target bundleno = 2030 (0x7ee), region = 56  ;;  %s6656_s8 = sshll.u32 (!%p7945_p8), %s6653_s18, 7 }
  0x93   : > { %s404_s24 = scalar_lea.sflag (!%p7945_p8), [#allocation3], %s6653_s18  ;;  %s6660_s1 = scalar_lea.vmem (!%p7945_p8), [#allocation2], %s6656_s8 }
  0x99   : > { %6313 = dma.done.wait (%p7946_p11), %s404_s24, 2048  }
  0x9a   : > { %6315 = vsyncadd (%p7946_p11), %s404_s24, 4294965248  ;;  %s412_s0 = sand.u32 1, %s6514_s29   ;;  %s6668_s26 = scalar_lea.vmem [#allocation5], %s6656_s8 }
  0x9b   : > { %s413_s11 = scalar_lea.sflag [#allocation6], %s412_s0 }
  0x9c   : > { %6317 = dma.done.wait (%p7946_p11), %s413_s11, 4096  }
  0x9d   : > { %6319 = vsyncadd (%p7946_p11), %s413_s11, 4294963200  ;;  %s6675_s9 = scalar_lea.vmem [#allocation7], %s6656_s8  ;;  %p7947_p0 = scmp.eq.s32.totalorder %s6514_s29, 0 }
  0x9f   : > { %6321 = dma.done.wait (%p7947_p0), [#allocation9], 1024   ;;  %p7948_p1 = pmov %p7947_p0 }
  0xa0   : > { %v497_v0 = vld [vmem:[#allocation8] sm:$0xff]  ;;  %v498_v1 = vld [vmem:[#allocation8 + $0x8] sm:$0xff]  ;;  %v499_v2 = vld [vmem:[#allocation8 + $0x10] sm:$0xff]  ;;  %vm512_vm0 = vcmask 523264   ;;  %vm1048_vm3 = vcmask 130048   ;;  %s6354_s15 = smov 112  }
  0xa1   : > { %6323 = vsyncadd (%p7948_p1), [#allocation9], 4294966272  ;;  %v5632_v3 = vpack.c.bf16 %v498_v1, %v497_v0  ;;  %v500_v4 = vld [vmem:[#allocation8 + $0x18] sm:$0xff]  ;;  %v501_v6 = vld [vmem:[#allocation8 + $0x20] sm:$0xff]  ;;  %s6355_s17 = smov 96   ;;  %s6357_s23 = smov 64  }
  0xa2   : > { %v5636_v5 = vpack.c.bf16 %v500_v4, %v499_v2  ;;  %v502_v7 = vld [vmem:[#allocation8 + $0x28] sm:$0xff]  ;;  %v481_v8 = vld [vmem:[%s6660_s1] sm:$0xff]  ;;  %v503_v10 = vld [vmem:[#allocation8 + $0x30] sm:$0xff]  ;;  %s6358_s16 = smov 80   ;;  %s6361_s28 = smov 16  }
  0xa3   : > { %5633 = vmatprep.subr.bf16.mxu1 %v5632_v3  ;;  %5244 = vmatprep.mubr.msk.f32.mxu1 %vm512_vm0, %v481_v8  ;;  %v5640_v9 = vpack.c.bf16 %v502_v7, %v501_v6  ;;  %v504_v11 = vld [vmem:[#allocation8 + $0x38] sm:$0xff]  ;;  %v482_v13 = vld [vmem:[%s6660_s1 + $0x8] sm:$0xff]  ;;  %v483_v14 = vld [vmem:[%s6660_s1 + $0x10] sm:$0xff]  ;;  %s7392_s30 = scalar_lea.vmem [#allocation11], %s6656_s8  ;;  %s7951_s21 = sld [smem:[#allocation23_spill]] }
  0xa4   : > { %5635 = vmatpush3.bf16.msra.mxu1 %v5632_v3  ;;  %v5644_v12 = vpack.c.bf16 %v504_v11, %v503_v10  ;;  %v484_v15 = vld [vmem:[%s6660_s1 + $0x18] sm:$0xff]  ;;  %v485_v16 = vld [vmem:[%s6660_s1 + $0x20] sm:$0xff]  ;;  %v486_v17 = vld [vmem:[%s6660_s1 + $0x28] sm:$0xff]  ;;  %s5024_s27 = sshll.u32 %s6514_s29, 11  ;;  %s7952_s11 = sld [smem:[#allocation30_spill]] }
  0xa5   : > { %5637 = vmatprep.subr.bf16.mxu1 %v5636_v5  ;;  %v487_v18 = vld [vmem:[%s6660_s1 + $0x30] sm:$0xff]  ;;  %v488_v19 = vld [vmem:[%s6660_s1 + $0x38] sm:$0xff]  ;;  %v489_v20 = vld [vmem:[%s6660_s1 + $0x40] sm:$0xff]  ;;  %s4674_s19 = scalar_lea.sflag [#allocation12], %s6653_s18  ;;  %s6362_s7 = smov [#allocation11]  }
  0xa6   : > { %v490_v21 = vld [vmem:[%s6660_s1 + $0x48] sm:$0xff]  ;;  %v491_v22 = vld [vmem:[%s6660_s1 + $0x50] sm:$0xff]  ;;  %v492_v23 = vld [vmem:[%s6660_s1 + $0x58] sm:$0xff]  ;;  %s6244_s10 = sshll.u32 %s6362_s7, 4  ;;  %s6245_s10 = int_to_ptr.vmem [resolvable:$false] %s6244_s10 }
  0xa7   : > { %v493_v24 = vld [vmem:[%s6660_s1 + $0x60] sm:$0xff]  ;;  %v494_v25 = vld [vmem:[%s6660_s1 + $0x68] sm:$0xff]  ;;  %v495_v26 = vld [vmem:[%s6660_s1 + $0x70] sm:$0xff] }
  0xa8   : > { %5639 = vmatpush3.bf16.msra.mxu1 %v5636_v5  ;;  %v496_v27 = vld [vmem:[%s6660_s1 + $0x78] sm:$0xff]  ;;  %v6716_v28 = vld [vmem:[%s7885_s4] ss:$0 sm:$0xff] }
  0xa9   : > { %5641 = vmatprep.subr.bf16.mxu1 %v5640_v9  ;;  %v6721_v30 = vld [vmem:[%s7886_s5] ss:$0 sm:$0xff]  ;;  %p7953_p12 = scmp.ne.s32.totalorder %s7951_s21, 0 }
  0xac   : > { %5643 = vmatpush3.bf16.msra.mxu1 %v5640_v9 }
  0xad   : > { %5645 = vmatprep.subr.bf16.mxu1 %v5644_v12 }
  0xb0   : > { %5647 = vmatpush3.bf16.msra.mxu1 %v5644_v12 }
  0xb3   : > { %5245 = vmatmul.mubr.msk.f32.vlgmr.msra.gmra.mrb[0].mxu1 %vm512_vm0, %v482_v13 }
  0xb4   : > { %5247 = vmatprep.mubr.msk.f32.mxu1 %vm512_vm0, %v483_v14 }
  0xb7   : > { %5248 = vmatmul.mubr.msk.f32.gmra.mrb[2].mxu1 %vm512_vm0, %v484_v15 }
  0xb8   : > { %5250 = vmatprep.mubr.msk.f32.mxu1 %vm512_vm0, %v485_v16 }
  0xbb   : > { %5251 = vmatmul.mubr.msk.f32.gmra.mrb[4].mxu1 %vm512_vm0, %v486_v17 }
  0xbc   : > { %5253 = vmatprep.mubr.msk.f32.mxu1 %vm512_vm0, %v487_v18 }
  0xbf   : > { %5254 = vmatmul.mubr.msk.f32.gmra.mrb[6].mxu1 %vm512_vm0, %v488_v19 }
  0xc0   : > { %5256 = vmatprep.mubr.msk.f32.mxu1 %vm512_vm0, %v489_v20 }
  0xc3   : > { %5257 = vmatmul.mubr.msk.f32.gmra.mrb[8].mxu1 %vm512_vm0, %v490_v21 }
  0xc4   : > { %5259 = vmatprep.mubr.msk.f32.mxu1 %vm512_vm0, %v491_v22 }
  0xc7   : > { %5260 = vmatmul.mubr.msk.f32.gmra.mrb[10].mxu1 %vm512_vm0, %v492_v23 }
  0xc8   : > { %5262 = vmatprep.mubr.msk.f32.mxu1 %vm512_vm0, %v493_v24 }
  0xcb   : > { %5263 = vmatmul.mubr.msk.f32.gmra.mrb[12].mxu1 %vm512_vm0, %v494_v25 }
  0xcc   : > { %5265 = vmatprep.mubr.msk.f32.mxu1 %vm512_vm0, %v495_v26 }
  0xcf   : > { %5266 = vmatmul.mubr.msk.f32.gmra.mrb[14].mxu1 %vm512_vm0, %v496_v27 }
 0x186   : > { %v5246_v29 = vpop.f32.mrb[0].mxu1 }
 0x187   : > { %v633_v31 = vadd.f32 %v5246_v29, %v6716_v28  ;;  %v627_v32 = vpop.f32.mrb[1].mxu1 }
 0x188   : > { %v628_v33 = vadd.f32 %v6716_v28, %v627_v32 }
 0x189   : > { %vm708_vm1 = vcmp.ge.f32.partialorder %v633_v31, 0.0  ;;  %v730_v34 = vmul.f32 %v6721_v30, %v633_v31 }
 0x18a   : > { %vm707_vm2 = vcmp.ge.f32.partialorder %v628_v33, 0.0  ;;  %v729_v35 = vmul.f32 %v6721_v30, %v628_v33  ;;  %v5249_v36 = vpop.f32.mrb[2].mxu1 }
 0x18b   : > { %v6727_v37 = vsel %vm708_vm1, %v633_v31, %v730_v34  ;;  %v643_v38 = vadd.f32 %v5249_v36, %v6716_v28  ;;  %v637_v39 = vpop.f32.mrb[3].mxu1 }
 0x18c   : > { %v6730_v40 = vsel %vm707_vm2, %v628_v33, %v729_v35  ;;  %v638_v41 = vadd.f32 %v6716_v28, %v637_v39 }
 0x18d   : > { %vm710_vm4 = vcmp.ge.f32.partialorder %v643_v38, 0.0  ;;  %v732_v42 = vmul.f32 %v6721_v30, %v643_v38  ;;  %5300 = vmatprep.mubr.msk.f32.mxu1 %vm1048_vm3, %v6730_v40  ;;  %v6738_v43 = vpack.i.bf16 %v6727_v37, %v6730_v40 }
 0x18e   : > { %vm709_vm5 = vcmp.ge.f32.partialorder %v638_v41, 0.0  ;;  %v731_v44 = vmul.f32 %v6721_v30, %v638_v41  ;;  %v5252_v45 = vpop.f32.mrb[4].mxu1 }
 0x18f   : > { %v6741_v46 = vsel %vm710_vm4, %v643_v38, %v732_v42  ;;  %5929 = vrot.lane.b32.xlu0 %v6738_v43, %s6354_s15  ;;  %v653_v47 = vadd.f32 %v5252_v45, %v6716_v28  ;;  %v647_v48 = vpop.f32.mrb[5].mxu1  ;;  %vm6837_vm4 = vmpackc.low %vm1048_vm3, %vm1048_vm3 }
 0x190   : > { %v6746_v49 = vsel %vm709_vm5, %v638_v41, %v731_v44  ;;  %v648_v50 = vadd.f32 %v6716_v28, %v647_v48 }
 0x191   : > { %vm712_vm6 = vcmp.ge.f32.partialorder %v653_v47, 0.0  ;;  %v734_v51 = vmul.f32 %v6721_v30, %v653_v47  ;;  %v6752_v52 = vpack.i.bf16 %v6741_v46, %v6746_v49 }
 0x192   : > { %vm711_vm7 = vcmp.ge.f32.partialorder %v648_v50, 0.0  ;;  %v733_v53 = vmul.f32 %v6721_v30, %v648_v50  ;;  %v5255_v54 = vpop.f32.mrb[6].mxu1 }
 0x193   : > { %v6755_v55 = vsel %vm712_vm6, %v653_v47, %v734_v51  ;;  %5934 = vrot.lane.b32.xlu0 %v6752_v52, %s6354_s15  ;;  %v663_v56 = vadd.f32 %v5255_v54, %v6716_v28  ;;  %v657_v57 = vpop.f32.mrb[7].mxu1 }
 0x194   : > { %v6760_v58 = vsel %vm711_vm7, %v648_v50, %v733_v53  ;;  %v658_v59 = vadd.f32 %v6716_v28, %v657_v57 }
 0x195   : > { %vm714_vm8 = vcmp.ge.f32.partialorder %v663_v56, 0.0  ;;  %v736_v60 = vmul.f32 %v6721_v30, %v663_v56  ;;  %v5938_v61 = vpack.i.bf16 %v6755_v55, %v6760_v58 }
 0x196   : > { %vm713_vm9 = vcmp.ge.f32.partialorder %v658_v59, 0.0  ;;  %v735_v62 = vmul.f32 %v6721_v30, %v658_v59  ;;  %v5258_v63 = vpop.f32.mrb[8].mxu1 }
 0x197   : > { %v6767_v0 = vsel %vm714_vm8, %v663_v56, %v736_v60  ;;  %v673_v1 = vadd.f32 %v5258_v63, %v6716_v28  ;;  %v667_v2 = vpop.f32.mrb[9].mxu1  ;;  %5939 = vrot.lane.b32.xlu1 %v5938_v61, %s6354_s15 }
 0x198   : > { %v6771_v3 = vsel %vm713_vm9, %v658_v59, %v735_v62  ;;  %v668_v4 = vadd.f32 %v6716_v28, %v667_v2 }
 0x199   : > { %vm716_vm10 = vcmp.ge.f32.partialorder %v673_v1, 0.0  ;;  %v738_v5 = vmul.f32 %v6721_v30, %v673_v1  ;;  %v5943_v6 = vpack.i.bf16 %v6767_v0, %v6771_v3 }
 0x19a   : > { %vm715_vm11 = vcmp.ge.f32.partialorder %v668_v4, 0.0  ;;  %v737_v7 = vmul.f32 %v6721_v30, %v668_v4  ;;  %v5261_v8 = vpop.f32.mrb[10].mxu1 }
 0x19b   : > { %v6778_v9 = vsel %vm716_vm10, %v673_v1, %v738_v5  ;;  %v683_v10 = vadd.f32 %v5261_v8, %v6716_v28  ;;  %v677_v11 = vpop.f32.mrb[11].mxu1  ;;  %5944 = vrot.lane.b32.xlu1 %v5943_v6, %s6354_s15 }
 0x19c   : > { %v6782_v12 = vsel %vm715_vm11, %v668_v4, %v737_v7  ;;  %v678_v13 = vadd.f32 %v6716_v28, %v677_v11 }
 0x19d   : > { %vm718_vm12 = vcmp.ge.f32.partialorder %v683_v10, 0.0  ;;  %v740_v14 = vmul.f32 %v6721_v30, %v683_v10  ;;  %v5948_v15 = vpack.i.bf16 %v6778_v9, %v6782_v12 }
 0x19e   : > { %vm717_vm13 = vcmp.ge.f32.partialorder %v678_v13, 0.0  ;;  %v739_v16 = vmul.f32 %v6721_v30, %v678_v13  ;;  %v5264_v17 = vpop.f32.mrb[12].mxu1 }
 0x19f   : > { %v6789_v18 = vsel %vm718_vm12, %v683_v10, %v740_v14  ;;  %v693_v19 = vadd.f32 %v5264_v17, %v6716_v28  ;;  %v687_v20 = vpop.f32.mrb[13].mxu1  ;;  %5949 = vrot.lane.b32.xlu0 %v5948_v15, %s6354_s15 }
 0x1a0   : > { %v6793_v21 = vsel %vm717_vm13, %v678_v13, %v739_v16  ;;  %v688_v22 = vadd.f32 %v6716_v28, %v687_v20 }
 0x1a1   : > { %vm720_vm14 = vcmp.ge.f32.partialorder %v693_v19, 0.0  ;;  %v742_v23 = vmul.f32 %v6721_v30, %v693_v19  ;;  %v6799_v24 = vpack.i.bf16 %v6789_v18, %v6793_v21 }
 0x1a2   : > { %vm719_vm15 = vcmp.ge.f32.partialorder %v688_v22, 0.0  ;;  %v741_v25 = vmul.f32 %v6721_v30, %v688_v22  ;;  %v5267_v26 = vpop.f32.mrb[14].mxu1 }
 0x1a3   : > { %v6802_v27 = vsel %vm720_vm14, %v693_v19, %v742_v23  ;;  %v703_v29 = vadd.f32 %v5267_v26, %v6716_v28  ;;  %v697_v31 = vpop.f32.mrb[15].mxu1  ;;  %5954 = vrot.lane.b32.xlu1 %v6799_v24, %s6354_s15 }
 0x1a4   : > { %v6807_v32 = vsel %vm719_vm15, %v688_v22, %v741_v25  ;;  %v698_v33 = vadd.f32 %v6716_v28, %v697_v31 }
 0x1a5   : > { %vm722_vm1 = vcmp.ge.f32.partialorder %v703_v29, 0.0  ;;  %v744_v34 = vmul.f32 %v6721_v30, %v703_v29  ;;  %v6813_v35 = vpack.i.bf16 %v6802_v27, %v6807_v32 }
 0x1a6   : > { %vm721_vm2 = vcmp.ge.f32.partialorder %v698_v33, 0.0  ;;  %v743_v36 = vmul.f32 %v6721_v30, %v698_v33 }
 0x1a7   : > { %v6816_v38 = vsel %vm722_vm1, %v703_v29, %v744_v34  ;;  %5959 = vrot.lane.b32.xlu0 %v6813_v35, %s6354_s15 }
 0x1a8   : > { %v6820_v39 = vsel %vm721_vm2, %v698_v33, %v743_v36 }
 0x1a9   : > { %v6824_v28 = vpack.i.bf16 %v6816_v38, %v6820_v39 }
 0x1ab   : > { %5964 = vrot.lane.b32.xlu1 %v6824_v28, %s6354_s15  ;;  %5974 = vrot.lane.b32.xlu0 %v6752_v52, %s6355_s17  ;;  %s6246_s15 = scalar_lea.vmem %s6245_s10, 4096 }
 0x1af   : > { %5969 = vrot.lane.b32.xlu1 %v6738_v43, %s6355_s17  ;;  %5984 = vrot.lane.b32.xlu0 %v5943_v6, %s6355_s17 }
 0x1b3   : > { %5979 = vrot.lane.b32.xlu1 %v5938_v61, %s6355_s17 }
 0x1b7   : > { %5989 = vrot.lane.b32.xlu1 %v5948_v15, %s6355_s17 }
 0x201   : > { %v5930_v30 = vpop.permute.xlu0 %5929 }
 0x202   : > { %v5932_v41 = vunpack.i.h.bf16 %v5930_v30  ;;  %v5931_v42 = vunpack.i.l.bf16 %v5930_v30 }
 0x204   : > { %v5648_v45 = vpack.c.bf16 %v5932_v41, %v5931_v42 }
 0x205   : > { %v5935_v47 = vpop.permute.xlu0 %5934 }
 0x206   : > { %v5937_v48 = vunpack.i.h.bf16 %v5935_v47  ;;  %v5936_v50 = vunpack.i.l.bf16 %v5935_v47  ;;  %5650 = vmatprep.subr.msk.bf16.mxu1 %vm6837_vm4, %v5648_v45 }
 0x207   : > { %5653 = vmatpush3.bf16.xpose.msk.msra.mxu1 %vm6837_vm4, %v5648_v45 }
 0x208   : > { %v5654_v43 = vpack.c.bf16 %v5937_v48, %v5936_v50 }
 0x209   : > { %v5940_v51 = vpop.permute.xlu1 %5939 }
 0x20a   : > { %5656 = vmatprep.subr.msk.bf16.mxu1 %vm6837_vm4, %v5654_v43  ;;  %v5942_v52 = vunpack.i.h.bf16 %v5940_v51  ;;  %v5941_v53 = vunpack.i.l.bf16 %v5940_v51  ;;  %v761_v51 = vlaneseq }
 0x20c   : > { %v5660_v54 = vpack.c.bf16 %v5942_v52, %v5941_v53  ;;  %v6903_v52 = vshrl.u32 %v761_v51, 7 }
 0x20d   : > { %v5945_v56 = vpop.permute.xlu1 %5944 }
 0x20e   : > { %v5947_v57 = vunpack.i.h.bf16 %v5945_v56  ;;  %v5946_v59 = vunpack.i.l.bf16 %v5945_v56  ;;  %v763_v53 = vadd.s32 8, %v6903_v52 }
 0x20f   : > { %5659 = vmatpush3.bf16.xpose.msk.msra.mxu1 %vm6837_vm4, %v5654_v43 }
 0x210   : > { %5662 = vmatprep.subr.msk.bf16.mxu1 %vm6837_vm4, %v5660_v54  ;;  %v5666_v61 = vpack.c.bf16 %v5947_v57, %v5946_v59  ;;  %v789_v56 = vand.u32 7, %v763_v53  ;;  %v765_v59 = vadd.s32 24, %v6903_v52 }
 0x211   : > { %v5950_v60 = vpop.permute.xlu0 %5949 }
 0x212   : > { %v5952_v63 = vunpack.i.h.bf16 %v5950_v60  ;;  %v5951_v1 = vunpack.i.l.bf16 %v5950_v60  ;;  %v782_v60 = vand.u32 7, %v6903_v52 }
 0x214   : > { %v5672_v4 = vpack.c.bf16 %v5952_v63, %v5951_v1  ;;  %v764_v63 = vadd.s32 16, %v6903_v52 }
 0x215   : > { %v5955_v62 = vpop.permute.xlu1 %5954 }
 0x216   : > { %v5957_v7 = vunpack.i.h.bf16 %v5955_v62  ;;  %v5956_v8 = vunpack.i.l.bf16 %v5955_v62  ;;  %v803_v62 = vand.u32 7, %v765_v59 }
 0x217   : > { %5665 = vmatpush3.bf16.xpose.msk.msra.mxu1 %vm6837_vm4, %v5660_v54  ;;  %v971_v54 = vand.u32 127, %v761_v51  ;;  %v773_v51 = vadd.s32 88, %v6903_v52 }
 0x218   : > { %5668 = vmatprep.subr.msk.bf16.mxu1 %vm6837_vm4, %v5666_v61  ;;  %v5678_v16 = vpack.c.bf16 %v5957_v7, %v5956_v8 }
 0x219   : > { %v5960_v2 = vpop.permute.xlu0 %5959  ;;  %v6906_v57 = vand.u32 7, %v971_v54 }
 0x21a   : > { %v5962_v26 = vunpack.i.h.bf16 %v5960_v2  ;;  %v5961_v29 = vunpack.i.l.bf16 %v5960_v2 }
 0x21b   : > { %vm985_vm5 = vcmp.eq.s32.totalorder %v789_v56, %v6906_v57  ;;  %vm984_vm6 = vcmp.eq.s32.totalorder %v782_v60, %v6906_v57  ;;  %vm987_vm7 = vcmp.eq.s32.totalorder %v803_v62, %v6906_v57  ;;  %v774_v62 = vadd.s32 96, %v6903_v52 }
 0x21c   : > { %v5684_v30 = vpack.c.bf16 %v5962_v26, %v5961_v29  ;;  %v769_v26 = vadd.s32 56, %v6903_v52  ;;  %v770_v29 = vadd.s32 64, %v6903_v52 }
 0x21d   : > { %v5965_v5 = vpop.permute.xlu1 %5964  ;;  %v5975_v6 = vpop.permute.xlu0 %5974 }
 0x21e   : > { %v5977_v11 = vunpack.i.h.bf16 %v5975_v6  ;;  %v5976_v13 = vunpack.i.l.bf16 %v5975_v6  ;;  %v5967_v47 = vunpack.i.h.bf16 %v5965_v5  ;;  %v5966_v48 = vunpack.i.l.bf16 %v5965_v5 }
 0x21f   : > { %5671 = vmatpush3.bf16.xpose.msk.msra.mxu1 %vm6837_vm4, %v5666_v61 }
 0x220   : > { %5674 = vmatprep.subr.msk.bf16.mxu1 %vm6837_vm4, %v5672_v4  ;;  %v5700_v23 = vpack.c.bf16 %v5977_v11, %v5976_v13  ;;  %v5690_v43 = vpack.c.bf16 %v5967_v47, %v5966_v48  ;;  %v767_v11 = vadd.s32 40, %v6903_v52  ;;  %v838_v47 = vand.u32 7, %v770_v29 }
 0x221   : > { %v5970_v10 = vpop.permute.xlu1 %5969  ;;  %v5985_v25 = vpop.permute.xlu0 %5984  ;;  %v772_v48 = vadd.s32 80, %v6903_v52  ;;  %v777_v29 = vadd.s32 120, %v6903_v52 }
 0x222   : > { %v5972_v14 = vunpack.i.h.bf16 %v5970_v10  ;;  %v5971_v15 = vunpack.i.l.bf16 %v5970_v10  ;;  %v5987_v31 = vunpack.i.h.bf16 %v5985_v25  ;;  %v5986_v33 = vunpack.i.l.bf16 %v5985_v25 }
 0x223   : > { %v796_v10 = vand.u32 7, %v764_v63  ;;  %vm992_vm13 = vcmp.eq.s32.totalorder %v838_v47, %v6906_v57  ;;  %v887_v47 = vand.u32 7, %v777_v29 }
 0x224   : > { %v5696_v17 = vpack.c.bf16 %v5972_v14, %v5971_v15  ;;  %v5708_v41 = vpack.c.bf16 %v5987_v31, %v5986_v33  ;;  %v771_v33 = vadd.s32 72, %v6903_v52 }
 0x225   : > { %v5980_v19 = vpop.permute.xlu1 %5979  ;;  %vm986_vm8 = vcmp.eq.s32.totalorder %v796_v10, %v6906_v57 }
 0x226   : > { %v5982_v20 = vunpack.i.h.bf16 %v5980_v19  ;;  %v5981_v22 = vunpack.i.l.bf16 %v5980_v19  ;;  %5697 = vmatprep.subr.bf16.mxu0 %v5696_v17 }
 0x227   : > { %5677 = vmatpush3.bf16.xpose.msk.msra.mxu1 %vm6837_vm4, %v5672_v4  ;;  %5699 = vmatpush3.bf16.msra.mxu0 %v5696_v17  ;;  %v766_v4 = vadd.s32 32, %v6903_v52 }
 0x228   : > { %5701 = vmatprep.subr.bf16.mxu0 %v5700_v23  ;;  %5680 = vmatprep.subr.msk.bf16.mxu1 %vm6837_vm4, %v5678_v16  ;;  %v5704_v34 = vpack.c.bf16 %v5982_v20, %v5981_v22  ;;  %v817_v22 = vand.u32 7, %v767_v11  ;;  %v866_v11 = vand.u32 7, %v774_v62 }
 0x229   : > { %v5990_v36 = vpop.permute.xlu1 %5989  ;;  %v810_v15 = vand.u32 7, %v766_v4 }
 0x22a   : > { %v5992_v42 = vunpack.i.h.bf16 %v5990_v36  ;;  %v5991_v45 = vunpack.i.l.bf16 %v5990_v36  ;;  %vm989_vm10 = vcmp.eq.s32.totalorder %v817_v22, %v6906_v57  ;;  %vm996_vm2 = vcmp.eq.s32.totalorder %v866_v11, %v6906_v57 }
 0x22b   : > { %5703 = vmatpush3.bf16.msra.mxu0 %v5700_v23  ;;  %vm988_vm9 = vcmp.eq.s32.totalorder %v810_v15, %v6906_v57 }
 0x22c   : > { %5705 = vmatprep.subr.bf16.mxu0 %v5704_v34  ;;  %v5712_v50 = vpack.c.bf16 %v5992_v42, %v5991_v45  ;;  %v831_v45 = vand.u32 7, %v769_v26 }
 0x22e   : > { %vm991_vm12 = vcmp.eq.s32.totalorder %v831_v45, %v6906_v57 }
 0x22f   : > { %5683 = vmatpush3.bf16.xpose.msk.msra.mxu1 %vm6837_vm4, %v5678_v16  ;;  %5707 = vmatpush3.bf16.msra.mxu0 %v5704_v34  ;;  %v768_v16 = vadd.s32 48, %v6903_v52 }
 0x230   : > { %5709 = vmatprep.subr.bf16.mxu0 %v5708_v41  ;;  %5686 = vmatprep.subr.msk.bf16.mxu1 %vm6837_vm4, %v5684_v30 }
 0x231   : > { %v824_v25 = vand.u32 7, %v768_v16 }
 0x233   : > { %5711 = vmatpush3.bf16.msra.mxu0 %v5708_v41  ;;  %vm990_vm11 = vcmp.eq.s32.totalorder %v824_v25, %v6906_v57 }
 0x234   : > { %5713 = vmatprep.subr.bf16.mxu0 %v5712_v50 }
 0x237   : > { %5689 = vmatpush3.bf16.xpose.msk.msra.mxu1 %vm6837_vm4, %v5684_v30  ;;  %5715 = vmatpush3.bf16.msra.mxu0 %v5712_v50 }
 0x238   : > { %5692 = vmatprep.subr.msk.bf16.mxu1 %vm6837_vm4, %v5690_v43 }
 0x23f   : > { %5695 = vmatpush3.bf16.xpose.msk.msra.mxu1 %vm6837_vm4, %v5690_v43  ;;  %v845_v43 = vand.u32 7, %v771_v33 }
 0x241   : > { %vm993_vm14 = vcmp.eq.s32.totalorder %v845_v43, %v6906_v57 }
 0x246   : > { %5301 = vmatmul.mubr.msk.f32.vlgmr.msra.gmra.mrb[16].mxu1 %vm1048_vm3, %v6727_v37 }
 0x247   : > { %5303 = vmatprep.mubr.msk.f32.mxu1 %vm1048_vm3, %v6746_v49 }
 0x24a   : > { %5304 = vmatmul.mubr.msk.f32.gmra.mrb[18].mxu1 %vm1048_vm3, %v6741_v46 }
 0x24b   : > { %5306 = vmatprep.mubr.msk.f32.mxu1 %vm1048_vm3, %v6760_v58 }
 0x24e   : > { %5307 = vmatmul.mubr.msk.f32.gmra.mrb[20].mxu1 %vm1048_vm3, %v6755_v55 }
 0x24f   : > { %5309 = vmatprep.mubr.msk.f32.mxu1 %vm1048_vm3, %v6771_v3 }
 0x252   : > { %5310 = vmatmul.mubr.msk.f32.gmra.mrb[22].mxu1 %vm1048_vm3, %v6767_v0 }
 0x253   : > { %5312 = vmatprep.mubr.msk.f32.mxu1 %vm1048_vm3, %v6782_v12 }
 0x256   : > { %5313 = vmatmul.mubr.msk.f32.gmra.mrb[24].mxu1 %vm1048_vm3, %v6778_v9 }
 0x257   : > { %5315 = vmatprep.mubr.msk.f32.mxu1 %vm1048_vm3, %v6793_v21 }
 0x25a   : > { %5316 = vmatmul.mubr.msk.f32.gmra.mrb[26].mxu1 %vm1048_vm3, %v6789_v18 }
 0x25b   : > { %5318 = vmatprep.mubr.msk.f32.mxu1 %vm1048_vm3, %v6807_v32 }
 0x25e   : > { %5319 = vmatmul.mubr.msk.f32.gmra.mrb[28].mxu1 %vm1048_vm3, %v6802_v27 }
 0x25f   : > { %5321 = vmatprep.mubr.msk.f32.mxu1 %vm1048_vm3, %v6820_v39 }
 0x262   : > { %5322 = vmatmul.mubr.msk.f32.gmra.mrb[30].mxu1 %vm1048_vm3, %v6816_v38 }
 0x319   : > { %v5302_v61 = vpop.f32.mrb[16].mxu1 }
 0x31a   : > { %v1259_v1 = vmul.f32 0.25, %v5302_v61  ;;  %v1179_v2 = vpop.f32.mrb[17].mxu1  ;;  %v852_v61 = vand.u32 7, %v772_v48 }
 0x31b   : > { %v1258_v5 = vmul.f32 0.25, %v1179_v2 }
 0x31c   : > { %v6914_v6 = vsel %vm985_vm5, %v1259_v1, -1e+30  ;;  %v859_v1 = vand.u32 7, %v773_v51  ;;  %vm994_vm15 = vcmp.eq.s32.totalorder %v852_v61, %v6906_v57 }
 0x31d   : > { %1292 = vmax.xlane.f32.xlu1 %v6914_v6  ;;  %v5305_v7 = vpop.f32.mrb[18].mxu1  ;;  %v6917_v8 = vsel %vm984_vm6, %v1258_v5, -1e+30 }
 0x31e   : > { %v1261_v13 = vmul.f32 0.25, %v5305_v7  ;;  %1290 = vmax.xlane.f32.xlu0 %v6917_v8  ;;  %v1189_v14 = vpop.f32.mrb[19].mxu1  ;;  %vm995_vm1 = vcmp.eq.s32.totalorder %v859_v1, %v6906_v57 }
 0x31f   : > { %v1260_v19 = vmul.f32 0.25, %v1189_v14  ;;  %v776_v14 = vadd.s32 112, %v6903_v52 }
 0x320   : > { %v6923_v17 = vsel %vm987_vm7, %v1261_v13, -1e+30  ;;  %v775_v13 = vadd.s32 104, %v6903_v52  ;;  %vm999_vm7 = vcmp.eq.s32.totalorder %v887_v47, %v6906_v57 }
 0x321   : > { %v5308_v20 = vpop.f32.mrb[20].mxu1  ;;  %v6931_v30 = vsel %vm986_vm8, %v1260_v19, -1e+30  ;;  %v880_v26 = vand.u32 7, %v776_v14  ;;  %vm6359_vm8 = vmmov 0  }
 0x322   : > { %1296 = vmax.xlane.f32.xlu0 %v6923_v17  ;;  %v1199_v23 = vpop.f32.mrb[21].mxu1  ;;  %v1263_v34 = vmul.f32 0.25, %v5308_v20  ;;  %v873_v25 = vand.u32 7, %v775_v13 }
 0x323   : > { %v1262_v31 = vmul.f32 0.25, %v1199_v23  ;;  %vm998_vm6 = vcmp.eq.s32.totalorder %v880_v26, %v6906_v57 }
 0x324   : > { %v6941_v56 = vsel %vm989_vm10, %v1263_v34, -1e+30  ;;  %vm997_vm5 = vcmp.eq.s32.totalorder %v873_v25, %v6906_v57 }
 0x325   : > { %v5311_v36 = vpop.f32.mrb[22].mxu1  ;;  %v6933_v41 = vsel %vm988_vm9, %v1262_v31, -1e+30 }
 0x326   : > { %1294 = vmax.xlane.f32.xlu0 %v6931_v30  ;;  %1298 = vmax.xlane.f32.xlu1 %v6933_v41  ;;  %v1209_v42 = vpop.f32.mrb[23].mxu1  ;;  %v1265_v53 = vmul.f32 0.25, %v5311_v36 }
 0x327   : > { %v1264_v50 = vmul.f32 0.25, %v1209_v42 }
 0x328   : > { %v6950_v5 = vsel %vm991_vm12, %v1265_v53, -1e+30 }
 0x329   : > { %v5314_v54 = vpop.f32.mrb[24].mxu1  ;;  %v6943_v59 = vsel %vm990_vm11, %v1264_v50, -1e+30 }
 0x32a   : > { %1300 = vmax.xlane.f32.xlu0 %v6941_v56  ;;  %1302 = vmax.xlane.f32.xlu1 %v6943_v59  ;;  %v1219_v60 = vpop.f32.mrb[25].mxu1  ;;  %v1267_v2 = vmul.f32 0.25, %v5314_v54 }
 0x32b   : > { %v1266_v63 = vmul.f32 0.25, %v1219_v60 }
 0x32c   : > { %v6960_v20 = vsel %vm993_vm14, %v1267_v2, -1e+30 }
 0x32d   : > { %v5317_v4 = vpop.f32.mrb[26].mxu1  ;;  %v6952_v7 = vsel %vm992_vm13, %v1266_v63, -1e+30 }
 0x32e   : > { %1304 = vmax.xlane.f32.xlu0 %v6950_v5  ;;  %1306 = vmax.xlane.f32.xlu1 %v6952_v7  ;;  %v1229_v10 = vpop.f32.mrb[27].mxu1  ;;  %v1269_v16 = vmul.f32 0.25, %v5317_v4 }
 0x32f   : > { %v1268_v15 = vmul.f32 0.25, %v1229_v10 }
 0x330   : > { %v6969_v36 = vsel %vm995_vm1, %v1269_v16, -1e+30 }
 0x331   : > { %v5320_v19 = vpop.f32.mrb[28].mxu1  ;;  %v6962_v22 = vsel %vm994_vm15, %v1268_v15, -1e+30 }
 0x332   : > { %1308 = vmax.xlane.f32.xlu0 %v6960_v20  ;;  %1310 = vmax.xlane.f32.xlu1 %v6962_v22  ;;  %v1239_v23 = vpop.f32.mrb[29].mxu1  ;;  %v1271_v33 = vmul.f32 0.25, %v5320_v19 }
 0x333   : > { %v1270_v31 = vmul.f32 0.25, %v1239_v23 }
 0x334   : > { %v6977_v52 = vsel %vm997_vm5, %v1271_v33, -1e+30 }
 0x335   : > { %v5323_v34 = vpop.f32.mrb[30].mxu1  ;;  %v6971_v42 = vsel %vm996_vm2, %v1270_v31, -1e+30 }
 0x336   : > { %1312 = vmax.xlane.f32.xlu0 %v6969_v36  ;;  %1314 = vmax.xlane.f32.xlu1 %v6971_v42  ;;  %v1249_v45 = vpop.f32.mrb[31].mxu1  ;;  %v1273_v50 = vmul.f32 0.25, %v5323_v34 }
 0x337   : > { %v1272_v48 = vmul.f32 0.25, %v1249_v45 }
 0x338   : > { %v6984_v51 = vsel %vm999_vm7, %v1273_v50, -1e+30 }
 0x339   : > { %v6979_v43 = vsel %vm998_vm6, %v1272_v48, -1e+30 }
 0x33a   : > { %1316 = vmax.xlane.f32.xlu0 %v6977_v52  ;;  %1318 = vmax.xlane.f32.xlu1 %v6979_v43 }
 0x33e   : > { %1320 = vmax.xlane.f32.xlu0 %v6984_v51 }
 0x34b   : > { %5994 = vrot.lane.b32.xlu1 %v6799_v24, %s6355_s17 }
 0x354   : > { %5999 = vrot.lane.b32.xlu0 %v6813_v35, %s6355_s17 }
 0x3aa   : > { %v1293_v53 = vpop.xlane.xlu1 %1292 }
 0x3ab   : > { %v1323_v54 = vsub.f32 %v6914_v6, %v1293_v53  ;;  %v1291_v60 = vpop.xlane.xlu0 %1290 }
 0x3ac   : > { %v1322_v61 = vsub.f32 %v6917_v8, %v1291_v60 }
 0x3ad   : > { %v1340_v62 = vmul.f32 1.442695, %v1323_v54 }
 0x3ae   : > { %v1338_v63 = vmul.f32 1.442695, %v1322_v61 }
 0x3af   : > { %6008 = vpow2.f32 %v1340_v62  ;;  %v1297_v57 = vpop.xlane.xlu0 %1296 }
 0x3b0   : > { %6010 = vpow2.f32 %v1338_v63  ;;  %v1325_v1 = vsub.f32 %v6923_v17, %v1297_v57 }
 0x3b2   : > { %v1344_v2 = vmul.f32 1.442695, %v1325_v1 }
 0x3b3   : > { %v1295_v4 = vpop.xlane.xlu0 %1294  ;;  %v1299_v10 = vpop.xlane.xlu1 %1298 }
 0x3b4   : > { %6012 = vpow2.f32 %v1344_v2  ;;  %v1324_v24 = vsub.f32 %v6931_v30, %v1295_v4  ;;  %v1326_v35 = vsub.f32 %v6933_v41, %v1299_v10 }
 0x3b6   : > { %v1342_v11 = vmul.f32 1.442695, %v1324_v24  ;;  %v1346_v6 = vmul.f32 1.442695, %v1326_v35 }
 0x3b7   : > { %v1301_v13 = vpop.xlane.xlu0 %1300  ;;  %v1303_v14 = vpop.xlane.xlu1 %1302 }
 0x3b8   : > { %6014 = vpow2.f32 %v1342_v11  ;;  %v1327_v8 = vsub.f32 %v6941_v56, %v1301_v13  ;;  %v1328_v30 = vsub.f32 %v6943_v59, %v1303_v14 }
 0x3b9   : > { %v6997_v15 = vpop.eup %6008  ;;  %6016 = vpow2.f32 %v1346_v6 }
 0x3ba   : > { %v6999_v16 = vpop.eup %6010  ;;  %v1348_v17 = vmul.f32 1.442695, %v1327_v8  ;;  %1372 = vadd.xlane.f32.xlu0 %v6997_v15  ;;  %v1350_v31 = vmul.f32 1.442695, %v1328_v30  ;;  %v6356_v8 = vmov 0.0|0.0  }
 0x3bb   : > { %v1305_v19 = vpop.xlane.xlu0 %1304  ;;  %v1307_v23 = vpop.xlane.xlu1 %1306  ;;  %1370 = vadd.xlane.f32.xlu1 %v6999_v16  ;;  %5740 = vmatprep.subr.bf16.mxu1 %v6356_v8 }
 0x3bc   : > { %6018 = vpow2.f32 %v1348_v17  ;;  %v1329_v41 = vsub.f32 %v6950_v5, %v1305_v19  ;;  %v1330_v33 = vsub.f32 %v6952_v7, %v1307_v23 }
 0x3be   : > { %v7005_v25 = vpop.eup %6012  ;;  %v1352_v56 = vmul.f32 1.442695, %v1329_v41  ;;  %v1354_v59 = vmul.f32 1.442695, %v1330_v33 }
 0x3bf   : > { %v1309_v26 = vpop.xlane.xlu0 %1308  ;;  %v1311_v29 = vpop.xlane.xlu1 %1310  ;;  %1376 = vadd.xlane.f32.xlu0 %v7005_v25 }
 0x3c0   : > { %6020 = vpow2.f32 %v1352_v56  ;;  %v1332_v5 = vsub.f32 %v6962_v22, %v1311_v29  ;;  %v1331_v6 = vsub.f32 %v6960_v20, %v1309_v26 }
 0x3c1   : > { %6022 = vpow2.f32 %v1350_v31 }
 0x3c2   : > { %v7009_v34 = vpop.eup %6014  ;;  %6024 = vpow2.f32 %v1354_v59  ;;  %v1358_v54 = vmul.f32 1.442695, %v1332_v5  ;;  %v1356_v13 = vmul.f32 1.442695, %v1331_v6 }
 0x3c3   : > { %v7011_v45 = vpop.eup %6016  ;;  %v1313_v47 = vpop.xlane.xlu0 %1312  ;;  %1374 = vadd.xlane.f32.xlu0 %v7009_v34 }
 0x3c4   : > { %v1315_v48 = vpop.xlane.xlu1 %1314  ;;  %1378 = vadd.xlane.f32.xlu1 %v7011_v45  ;;  %6026 = vpow2.f32 %v1358_v54  ;;  %v1333_v14 = vsub.f32 %v6969_v36, %v1313_v47 }
 0x3c5   : > { %6028 = vpow2.f32 %v1356_v13  ;;  %v1334_v23 = vsub.f32 %v6971_v42, %v1315_v48 }
 0x3c6   : > { %v7016_v50 = vpop.eup %6018  ;;  %v1360_v17 = vmul.f32 1.442695, %v1333_v14 }
 0x3c7   : > { %v1317_v53 = vpop.xlane.xlu0 %1316  ;;  %1380 = vadd.xlane.f32.xlu0 %v7016_v50  ;;  %v1362_v41 = vmul.f32 1.442695, %v1334_v23 }
 0x3c8   : > { %v1319_v7 = vpop.xlane.xlu1 %1318  ;;  %6030 = vpow2.f32 %v1360_v17 }
 0x3c9   : > { %v1336_v56 = vsub.f32 %v6979_v43, %v1319_v7 }
 0x3ca   : > { %v7019_v60 = vpop.eup %6020 }
 0x3cb   : > { %1384 = vadd.xlane.f32.xlu0 %v7019_v60  ;;  %v1321_v61 = vpop.xlane.xlu0 %1320  ;;  %v7022_v22 = vpop.eup %6022  ;;  %v1366_v29 = vmul.f32 1.442695, %v1336_v56 }
 0x3cc   : > { %v5995_v62 = vpop.permute.xlu1 %5994  ;;  %v7025_v24 = vpop.eup %6024 }
 0x3cd   : > { %v5997_v63 = vunpack.i.h.bf16 %v5995_v62  ;;  %v5996_v57 = vunpack.i.l.bf16 %v5995_v62 }
 0x3ce   : > { %v7030_v11 = vpop.eup %6026 }
 0x3cf   : > { %v5716_v1 = vpack.c.bf16 %v5997_v63, %v5996_v57  ;;  %1382 = vadd.xlane.f32.xlu0 %v7022_v22  ;;  %v6000_v2 = vpop.permute.xlu0 %5999  ;;  %v7041_v20 = vpop.eup %6028  ;;  %v1627_v57 = vld [vmem:[%s6668_s26] sm:$0xff] }
 0x3d0   : > { %v6002_v4 = vunpack.i.h.bf16 %v6000_v2  ;;  %v6001_v10 = vunpack.i.l.bf16 %v6000_v2 }
 0x3d1   : > { %5717 = vmatprep.subr.bf16.mxu0 %v5716_v1 }
 0x3d2   : > { %5719 = vmatpush3.bf16.msra.mxu0 %v5716_v1  ;;  %v5720_v35 = vpack.c.bf16 %v6002_v4, %v6001_v10  ;;  %v7044_v36 = vpop.eup %6030 }
 0x3d3   : > { %1386 = vadd.xlane.f32.xlu0 %v7025_v24 }
 0x3d4   : > { %5721 = vmatprep.subr.bf16.mxu0 %v5720_v35 }
 0x3d5   : > { %6004 = vrot.lane.b32.xlu1 %v6824_v28, %s6355_s17  ;;  %v1335_v28 = vsub.f32 %v6977_v52, %v1317_v53  ;;  %v1337_v52 = vsub.f32 %v6984_v51, %v1321_v61 }
 0x3d6   : > { %5723 = vmatpush3.bf16.msra.mxu0 %v5720_v35 }
 0x3d7   : > { %1390 = vadd.xlane.f32.xlu0 %v7030_v11  ;;  %v1364_v19 = vmul.f32 1.442695, %v1335_v28  ;;  %v1368_v26 = vmul.f32 1.442695, %v1337_v52 }
 0x3d9   : > { %6032 = vpow2.f32 %v1364_v19 }
 0x3da   : > { %6034 = vpow2.f32 %v1362_v41 }
 0x3db   : > { %6036 = vpow2.f32 %v1368_v26 }
 0x3dc   : > { %6038 = vpow2.f32 %v1366_v29 }
 0x3e3   : > { %v7048_v30 = vpop.eup %6032 }
 0x3e4   : > { %v7053_v31 = vpop.eup %6034 }
 0x3e5   : > { %v7058_v42 = vpop.eup %6036 }
 0x3e6   : > { %v7063_v43 = vpop.eup %6038 }
 0x3ed   : > { %1643 = vrot.lane.b32.xlu0 %v6730_v40, %s6357_s23 }
 0x3f1   : > { %1645 = vrot.lane.b32.xlu0 %v6727_v37, %s6357_s23 }
 0x3f9   : > { %1388 = vadd.xlane.f32.xlu1 %v7041_v20 }
 0x3fd   : > { %1392 = vadd.xlane.f32.xlu1 %v7044_v36 }
 0x401   : > { %1396 = vadd.xlane.f32.xlu1 %v7048_v30 }
 0x410   : > { %1394 = vadd.xlane.f32.xlu0 %v7053_v31 }
 0x412   : > { %1647 = vrot.lane.b32.xlu1 %v6746_v49, %s6357_s23 }
 0x414   : > { %1400 = vadd.xlane.f32.xlu0 %v7058_v42 }
 0x416   : > { %1849 = vrot.lane.b32.xlu1 %v6746_v49, %s6358_s16  ;;  %v6360_v49 = vmov 0.0  }
 0x417   : > { %5405 = vmatprep.mubr.msk.f32.mxu1 %vm6359_vm8, %v6360_v49 }
 0x418   : > { %1398 = vadd.xlane.f32.xlu0 %v7063_v43 }
 0x41a   : > { %1655 = vrot.lane.b32.xlu1 %v6771_v3, %s6357_s23 }
 0x41e   : > { %2007 = vrot.lane.b32.xlu1 %v6760_v58, %s6358_s16 }
 0x422   : > { %1659 = vrot.lane.b32.xlu1 %v6782_v12, %s6357_s23 }
 0x426   : > { %2165 = vrot.lane.b32.xlu1 %v6771_v3, %s6358_s16 }
 0x42a   : > { %1663 = vrot.lane.b32.xlu1 %v6793_v21, %s6357_s23 }
 0x42e   : > { %2323 = vrot.lane.b32.xlu1 %v6782_v12, %s6358_s16  ;;  %1691 = vrot.lane.b32.xlu0 %v6730_v40, %s6358_s16 }
 0x432   : > { %1667 = vrot.lane.b32.xlu1 %v6807_v32, %s6357_s23  ;;  %1649 = vrot.lane.b32.xlu0 %v6741_v46, %s6357_s23 }
 0x436   : > { %2481 = vrot.lane.b32.xlu1 %v6793_v21, %s6358_s16  ;;  %1770 = vrot.lane.b32.xlu0 %v6727_v37, %s6358_s16 }
 0x43a   : > { %1671 = vrot.lane.b32.xlu1 %v6820_v39, %s6357_s23  ;;  %1651 = vrot.lane.b32.xlu0 %v6760_v58, %s6357_s23 }
 0x43e   : > { %2639 = vrot.lane.b32.xlu1 %v6807_v32, %s6358_s16  ;;  %1653 = vrot.lane.b32.xlu0 %v6755_v55, %s6357_s23 }
 0x442   : > { %2797 = vrot.lane.b32.xlu1 %v6820_v39, %s6358_s16  ;;  %1928 = vrot.lane.b32.xlu0 %v6741_v46, %s6358_s16 }
 0x446   : > { %1657 = vrot.lane.b32.xlu0 %v6767_v0, %s6357_s23 }
 0x447   : > { %v1373_v37 = vpop.xlane.xlu0 %1372 }
 0x448   : > { %v1371_v40 = vpop.xlane.xlu1 %1370 }
 0x449   : > { %6040 = vrcp.f32 %v1371_v40 }
 0x44a   : > { %2086 = vrot.lane.b32.xlu0 %v6755_v55, %s6358_s16  ;;  %6042 = vrcp.f32 %v1373_v37 }
 0x44c   : > { %v1377_v58 = vpop.xlane.xlu0 %1376 }
 0x44e   : > { %1661 = vrot.lane.b32.xlu0 %v6778_v9, %s6357_s23 }
 0x450   : > { %v1375_v3 = vpop.xlane.xlu0 %1374 }
 0x451   : > { %6044 = vrcp.f32 %v1375_v3  ;;  %v1379_v12 = vpop.xlane.xlu1 %1378 }
 0x452   : > { %2244 = vrot.lane.b32.xlu0 %v6767_v0, %s6358_s16  ;;  %6046 = vrcp.f32 %v1377_v58 }
 0x453   : > { %v6041_v46 = vpop.eup %6040  ;;  %6048 = vrcp.f32 %v1379_v12  ;;  %v1628_v12 = vld [vmem:[%s6668_s26 + $0x8] sm:$0xff] }
 0x454   : > { %v1381_v21 = vpop.xlane.xlu0 %1380  ;;  %v1418_v32 = vmul.f32 %v6041_v46, %v6999_v16  ;;  %v6043_v48 = vpop.eup %6042 }
 0x455   : > { %v6005_v39 = vpop.permute.xlu1 %6004  ;;  %6050 = vrcp.f32 %v1381_v21  ;;  %v1419_v16 = vmul.f32 %v6043_v48, %v6997_v15 }
 0x456   : > { %v6007_v51 = vunpack.i.h.bf16 %v6005_v39  ;;  %v6006_v55 = vunpack.i.l.bf16 %v6005_v39  ;;  %1665 = vrot.lane.b32.xlu0 %v6789_v18, %s6357_s23  ;;  %5356 = vmatprep.mubr.f32.mxu0 %v1418_v32  ;;  %v1629_v39 = vld [vmem:[%s6668_s26 + $0x10] sm:$0xff] }
 0x458   : > { %v5724_v33 = vpack.c.bf16 %v6007_v51, %v6006_v55  ;;  %v1385_v47 = vpop.xlane.xlu0 %1384 }
 0x459   : > { %6052 = vrcp.f32 %v1385_v47 }
 0x45a   : > { %5725 = vmatprep.subr.bf16.mxu0 %v5724_v33  ;;  %2402 = vrot.lane.b32.xlu0 %v6778_v9, %s6358_s16 }
 0x45b   : > { %v6045_v0 = vpop.eup %6044  ;;  %5727 = vmatpush3.bf16.msra.mxu0 %v5724_v33 }
 0x45c   : > { %v1383_v59 = vpop.xlane.xlu0 %1382  ;;  %v1420_v5 = vmul.f32 %v6045_v0, %v7009_v34  ;;  %5728 = vmatprep.subr.bf16.mxu0 %v6356_v8  ;;  %v6047_v53 = vpop.eup %6046  ;;  %v1634_v0 = vld [vmem:[%s6668_s26 + $0x38] sm:$0xff] }
 0x45d   : > { %6054 = vrcp.f32 %v1383_v59  ;;  %v6049_v7 = vpop.eup %6048  ;;  %v1421_v54 = vmul.f32 %v6047_v53, %v7005_v25  ;;  %v1631_v59 = vld [vmem:[%s6668_s26 + $0x20] sm:$0xff] }
 0x45e   : > { %5357 = vmatmul.mubr.f32.vlgmr.msra.gmra.mrb[0].mxu0 %v1419_v16  ;;  %1669 = vrot.lane.b32.xlu0 %v6802_v27, %s6357_s23  ;;  %v1422_v15 = vmul.f32 %v6049_v7, %v7011_v45 }
 0x45f   : > { %5359 = vmatprep.mubr.f32.mxu0 %v1420_v5  ;;  %v6051_v61 = vpop.eup %6050 }
 0x460   : > { %v1387_v9 = vpop.xlane.xlu0 %1386  ;;  %v1423_v62 = vmul.f32 %v6051_v61, %v7016_v50 }
 0x461   : > { %6056 = vrcp.f32 %v1387_v9 }
 0x462   : > { %5360 = vmatmul.mubr.f32.gmra.mrb[2].mxu0 %v1421_v54  ;;  %2560 = vrot.lane.b32.xlu0 %v6789_v18, %s6358_s16  ;;  %v1636_v54 = vld [vmem:[%s6668_s26 + $0x48] sm:$0xff] }
 0x463   : > { %5362 = vmatprep.mubr.f32.mxu0 %v1422_v15  ;;  %v6053_v63 = vpop.eup %6052  ;;  %v1633_v15 = vld [vmem:[%s6668_s26 + $0x30] sm:$0xff] }
 0x464   : > { %v1391_v34 = vpop.xlane.xlu0 %1390  ;;  %v1425_v4 = vmul.f32 %v6053_v63, %v7019_v60 }
 0x465   : > { %6058 = vrcp.f32 %v1391_v34 }
 0x466   : > { %5363 = vmatmul.mubr.f32.gmra.mrb[4].mxu0 %v1423_v62  ;;  %1673 = vrot.lane.b32.xlu0 %v6816_v38, %s6357_s23 }
 0x467   : > { %v6055_v1 = vpop.eup %6054 }
 0x468   : > { %v7128_v25 = vpop.permute.xlu0 %1643  ;;  %v1424_v2 = vmul.f32 %v6055_v1, %v7022_v22 }
 0x469   : > { %v5729_v45 = vpack.c.bf16 %v7128_v25, %v1627_v57 }
 0x46a   : > { %2718 = vrot.lane.b32.xlu0 %v6802_v27, %s6358_s16  ;;  %5365 = vmatprep.mubr.f32.mxu0 %v1424_v2  ;;  %v1638_v2 = vld [vmem:[%s6668_s26 + $0x58] sm:$0xff] }
 0x46b   : > { %v6057_v18 = vpop.eup %6056  ;;  %5366 = vmatmul.mubr.f32.gmra.mrb[6].mxu0 %v1425_v4 }
 0x46c   : > { %5731 = vmatpush3.bf16.xpose.msk.msra.mxu0 %vm6837_vm4, %v5729_v45  ;;  %v1426_v50 = vmul.f32 %v6057_v18, %v7025_v24  ;;  %v1635_v45 = vld [vmem:[%s6668_s26 + $0x40] sm:$0xff] }
 0x46d   : > { %5732 = vmatprep.subr.bf16.mxu0 %v6356_v8 }
 0x46e   : > { %2876 = vrot.lane.b32.xlu0 %v6816_v38, %s6358_s16  ;;  %5368 = vmatprep.mubr.f32.mxu0 %v1426_v50  ;;  %v7144_v38 = vpop.permute.xlu0 %1645 }
 0x46f   : > { %v6059_v27 = vpop.eup %6058  ;;  %v5733_v21 = vpack.c.bf16 %v7144_v38, %v1628_v12 }
 0x470   : > { %v1428_v6 = vmul.f32 %v6059_v27, %v7030_v11  ;;  %v1640_v27 = vld [vmem:[%s6668_s26 + $0x68] sm:$0xff] }
 0x486   : > { %v1389_v22 = vpop.xlane.xlu1 %1388 }
 0x487   : > { %6060 = vrcp.f32 %v1389_v22 }
 0x48a   : > { %v1393_v60 = vpop.xlane.xlu1 %1392 }
 0x48b   : > { %6062 = vrcp.f32 %v1393_v60 }
 0x48e   : > { %v1397_v14 = vpop.xlane.xlu1 %1396 }
 0x48f   : > { %6064 = vrcp.f32 %v1397_v14 }
 0x491   : > { %v6061_v10 = vpop.eup %6060 }
 0x492   : > { %v1427_v35 = vmul.f32 %v6061_v10, %v7041_v20  ;;  %v7149_v56 = vpop.permute.xlu1 %1647  ;;  %v1637_v10 = vld [vmem:[%s6668_s26 + $0x50] sm:$0xff] }
 0x493   : > { %v5737_v33 = vpack.c.bf16 %v7149_v56, %v1629_v39 }
 0x494   : > { %5369 = vmatmul.mubr.f32.gmra.mrb[8].mxu0 %v1427_v35 }
 0x495   : > { %v6063_v13 = vpop.eup %6062  ;;  %5371 = vmatprep.mubr.f32.mxu0 %v1428_v6 }
 0x496   : > { %v1429_v24 = vmul.f32 %v6063_v13, %v7044_v36  ;;  %v1630_v36 = vld [vmem:[%s6668_s26 + $0x18] sm:$0xff]  ;;  %v1850_v3 = vpop.permute.xlu1 %1849 }
 0x498   : > { %5372 = vmatmul.mubr.f32.gmra.mrb[10].mxu0 %v1429_v24 }
 0x499   : > { %v6065_v20 = vpop.eup %6064 }
 0x49a   : > { %v1431_v52 = vmul.f32 %v6065_v20, %v7048_v30  ;;  %v7166_v32 = vpop.permute.xlu1 %1655 }
 0x49b   : > { %v5753_v63 = vpack.c.bf16 %v7166_v32, %v1633_v15 }
 0x49d   : > { %v1395_v17 = vpop.xlane.xlu0 %1394 }
 0x49e   : > { %6066 = vrcp.f32 %v1395_v17  ;;  %v2008_v47 = vpop.permute.xlu1 %2007  ;;  %v1642_v17 = vld [vmem:[%s6668_s26 + $0x78] sm:$0xff] }
 0x4a1   : > { %v1401_v28 = vpop.xlane.xlu0 %1400 }
 0x4a2   : > { %6068 = vrcp.f32 %v1401_v28  ;;  %v7195_v16 = vpop.permute.xlu1 %1659 }
 0x4a3   : > { %v5761_v50 = vpack.c.bf16 %v7195_v16, %v1635_v45 }
 0x4a5   : > { %v1399_v19 = vpop.xlane.xlu0 %1398 }
 0x4a6   : > { %6070 = vrcp.f32 %v1399_v19  ;;  %v2166_v61 = vpop.permute.xlu1 %2165  ;;  %v1639_v19 = vld [vmem:[%s6668_s26 + $0x60] sm:$0xff] }
 0x4a8   : > { %v6067_v23 = vpop.eup %6066 }
 0x4a9   : > { %v1692_v11 = vpop.permute.xlu0 %1691  ;;  %v1430_v41 = vmul.f32 %v6067_v23, %v7053_v31 }
 0x4aa   : > { %v7224_v57 = vpop.permute.xlu1 %1663 }
 0x4ab   : > { %5374 = vmatprep.mubr.f32.mxu0 %v1430_v41  ;;  %v5769_v24 = vpack.c.bf16 %v7224_v57, %v1637_v10 }
 0x4ac   : > { %5375 = vmatmul.mubr.f32.gmra.mrb[12].mxu0 %v1431_v52  ;;  %v6069_v37 = vpop.eup %6068  ;;  %v1641_v52 = vld [vmem:[%s6668_s26 + $0x70] sm:$0xff] }
 0x4ad   : > { %v7151_v26 = vpop.permute.xlu0 %1649  ;;  %v1433_v30 = vmul.f32 %v6069_v37, %v7058_v42  ;;  %v1632_v42 = vld [vmem:[%s6668_s26 + $0x28] sm:$0xff]  ;;  %s7701_s26 = scalar_lea.hbm %s7952_s11, %s5024_s27 }
 0x4ae   : > { %v5741_v29 = vpack.c.bf16 %v7151_v26, %v1630_v36  ;;  %v2324_v22 = vpop.permute.xlu1 %2323 }
 0x4b0   : > { %v6071_v40 = vpop.eup %6070  ;;  %5743 = vmatpush3.bf16.xpose.msk.msra.mxu1 %vm6837_vm4, %v5741_v29 }
 0x4b1   : > { %v1771_v58 = vpop.permute.xlu0 %1770  ;;  %v1432_v31 = vmul.f32 %v6071_v40, %v7063_v43  ;;  %5748 = vmatprep.subr.bf16.mxu1 %v6356_v8 }
 0x4b2   : > { %v7253_v35 = vpop.permute.xlu1 %1667 }
 0x4b3   : > { %5377 = vmatprep.mubr.f32.mxu0 %v1432_v31  ;;  %v1675_v31 = vld [vmem:[%s6675_s9] sm:$0xff] }
 0x4b4   : > { %5378 = vmatmul.mubr.f32.gmra.mrb[14].mxu0 %v1433_v30 }
 0x4b5   : > { %v7160_v46 = vpop.permute.xlu0 %1651  ;;  %5384 = vmatprep.mubr.msk.f32.mxu0 %vm6359_vm8, %v6360_v49 }
 0x4b6   : > { %v5745_v7 = vpack.c.bf16 %v7160_v46, %v1631_v59  ;;  %v2482_v28 = vpop.permute.xlu1 %2481 }
 0x4b8   : > { %5385 = vmatmul.mubr.msk.f32.vlgmr.msra.gmra.mrb[16].mxu0 %vm1048_vm3, %v1692_v11  ;;  %v5777_v11 = vpack.c.bf16 %v7253_v35, %v1639_v19 }
 0x4b9   : > { %5735 = vmatpush3.bf16.xpose.msk.msra.mxu0 %vm6837_vm4, %v5733_v21  ;;  %v7170_v43 = vpop.permute.xlu0 %1653  ;;  %5391 = vmatprep.mubr.msk.f32.mxu0 %vm6359_vm8, %v6360_v49 }
 0x4ba   : > { %5736 = vmatprep.subr.bf16.mxu0 %v6356_v8  ;;  %v5749_v51 = vpack.c.bf16 %v7170_v43, %v1632_v42  ;;  %v7282_v41 = vpop.permute.xlu1 %1671 }
 0x4bb   : > { %v5785_v29 = vpack.c.bf16 %v7282_v41, %v1641_v52 }
 0x4bd   : > { %v1929_v55 = vpop.permute.xlu0 %1928 }
 0x4be   : > { %5406 = vmatmul.mubr.msk.f32.vlgmr.msra.gmra.mrb[32].mxu1 %vm1048_vm3, %v1929_v55  ;;  %v2640_v37 = vpop.permute.xlu1 %2639 }
 0x4bf   : > { %5751 = vmatpush3.bf16.xpose.msk.msra.mxu1 %vm6837_vm4, %v5749_v51  ;;  %5419 = vmatprep.mubr.msk.f32.mxu1 %vm6359_vm8, %v6360_v49 }
 0x4c0   : > { %5392 = vmatmul.mubr.msk.f32.vlgmr.msra.gmra.mrb[18].mxu0 %vm1048_vm3, %v1771_v58  ;;  %5756 = vmatprep.subr.bf16.mxu1 %v6356_v8  ;;  %v1676_v58 = vld [vmem:[%s6675_s9 + $0x8] sm:$0xff] }
 0x4c1   : > { %5739 = vmatpush3.bf16.xpose.msk.msra.mxu0 %vm6837_vm4, %v5737_v33  ;;  %v7188_v48 = vpop.permute.xlu0 %1657  ;;  %5398 = vmatprep.mubr.msk.f32.mxu0 %vm6359_vm8, %v6360_v49 }
 0x4c2   : > { %5744 = vmatprep.subr.bf16.mxu0 %v6356_v8  ;;  %v5757_v5 = vpack.c.bf16 %v7188_v48, %v1634_v0  ;;  %v2798_v40 = vpop.permute.xlu1 %2797 }
 0x4c5   : > { %v2087_v53 = vpop.permute.xlu0 %2086 }
 0x4c6   : > { %5420 = vmatmul.mubr.msk.f32.vlgmr.msra.gmra.mrb[34].mxu1 %vm1048_vm3, %v2087_v53 }
 0x4c7   : > { %5759 = vmatpush3.bf16.xpose.msk.msra.mxu1 %vm6837_vm4, %v5757_v5  ;;  %5433 = vmatprep.mubr.msk.f32.mxu1 %vm6359_vm8, %v6360_v49 }
 0x4c8   : > { %5399 = vmatmul.mubr.msk.f32.vlgmr.msra.gmra.mrb[20].mxu0 %vm1048_vm3, %v1850_v3  ;;  %5764 = vmatprep.subr.bf16.mxu1 %v6356_v8 }
 0x4c9   : > { %5747 = vmatpush3.bf16.xpose.msk.msra.mxu0 %vm6837_vm4, %v5745_v7  ;;  %v7208_v9 = vpop.permute.xlu0 %1661  ;;  %5412 = vmatprep.mubr.msk.f32.mxu0 %vm6359_vm8, %v6360_v49 }
 0x4ca   : > { %5752 = vmatprep.subr.bf16.mxu0 %v6356_v8  ;;  %v5765_v34 = vpack.c.bf16 %v7208_v9, %v1636_v54 }
 0x4cd   : > { %v2245_v62 = vpop.permute.xlu0 %2244 }
 0x4ce   : > { %5434 = vmatmul.mubr.msk.f32.vlgmr.msra.gmra.mrb[36].mxu1 %vm1048_vm3, %v2245_v62 }
 0x4cf   : > { %5767 = vmatpush3.bf16.xpose.msk.msra.mxu1 %vm6837_vm4, %v5765_v34  ;;  %5447 = vmatprep.mubr.msk.f32.mxu1 %vm6359_vm8, %v6360_v49 }
 0x4d0   : > { %5413 = vmatmul.mubr.msk.f32.vlgmr.msra.gmra.mrb[22].mxu0 %vm1048_vm3, %v2008_v47  ;;  %5772 = vmatprep.subr.bf16.mxu1 %v6356_v8 }
 0x4d1   : > { %5755 = vmatpush3.bf16.xpose.msk.msra.mxu0 %vm6837_vm4, %v5753_v63  ;;  %v7228_v1 = vpop.permute.xlu0 %1665  ;;  %5426 = vmatprep.mubr.msk.f32.mxu0 %vm6359_vm8, %v6360_v49 }
 0x4d2   : > { %5760 = vmatprep.subr.bf16.mxu0 %v6356_v8  ;;  %v5773_v4 = vpack.c.bf16 %v7228_v1, %v1638_v2 }
 0x4d5   : > { %v2403_v18 = vpop.permute.xlu0 %2402 }
 0x4d6   : > { %5448 = vmatmul.mubr.msk.f32.vlgmr.msra.gmra.mrb[38].mxu1 %vm1048_vm3, %v2403_v18 }
 0x4d7   : > { %5775 = vmatpush3.bf16.xpose.msk.msra.mxu1 %vm6837_vm4, %v5773_v4  ;;  %5461 = vmatprep.mubr.msk.f32.mxu1 %vm6359_vm8, %v6360_v49 }
 0x4d8   : > { %5427 = vmatmul.mubr.msk.f32.vlgmr.msra.gmra.mrb[24].mxu0 %vm1048_vm3, %v2166_v61  ;;  %5780 = vmatprep.subr.bf16.mxu1 %v6356_v8 }
 0x4d9   : > { %5763 = vmatpush3.bf16.xpose.msk.msra.mxu0 %vm6837_vm4, %v5761_v50  ;;  %v7246_v60 = vpop.permute.xlu0 %1669  ;;  %5440 = vmatprep.mubr.msk.f32.mxu0 %vm6359_vm8, %v6360_v49 }
 0x4da   : > { %5768 = vmatprep.subr.bf16.mxu0 %v6356_v8  ;;  %v5781_v6 = vpack.c.bf16 %v7246_v60, %v1640_v27 }
 0x4dd   : > { %v2561_v13 = vpop.permute.xlu0 %2560 }
 0x4de   : > { %5462 = vmatmul.mubr.msk.f32.vlgmr.msra.gmra.mrb[40].mxu1 %vm1048_vm3, %v2561_v13 }
 0x4df   : > { %5783 = vmatpush3.bf16.xpose.msk.msra.mxu1 %vm6837_vm4, %v5781_v6  ;;  %5475 = vmatprep.mubr.msk.f32.mxu1 %vm6359_vm8, %v6360_v49 }
 0x4e0   : > { %5441 = vmatmul.mubr.msk.f32.vlgmr.msra.gmra.mrb[26].mxu0 %vm1048_vm3, %v2324_v22  ;;  %5788 = vmatprep.subr.bf16.mxu1 %v6356_v8 }
 0x4e1   : > { %5771 = vmatpush3.bf16.xpose.msk.msra.mxu0 %vm6837_vm4, %v5769_v24  ;;  %v7266_v14 = vpop.permute.xlu0 %1673  ;;  %5454 = vmatprep.mubr.msk.f32.mxu0 %vm6359_vm8, %v6360_v49 }
 0x4e2   : > { %5776 = vmatprep.subr.bf16.mxu0 %v6356_v8  ;;  %v5789_v20 = vpack.c.bf16 %v7266_v14, %v1642_v17 }
 0x4e5   : > { %v2719_v23 = vpop.permute.xlu0 %2718 }
 0x4e6   : > { %5476 = vmatmul.mubr.msk.f32.vlgmr.msra.gmra.mrb[42].mxu1 %vm1048_vm3, %v2719_v23 }
 0x4e7   : > { %5791 = vmatpush3.bf16.xpose.msk.msra.mxu1 %vm6837_vm4, %v5789_v20  ;;  %5489 = vmatprep.mubr.msk.f32.mxu1 %vm6359_vm8, %v6360_v49 }
 0x4e8   : > { %5455 = vmatmul.mubr.msk.f32.vlgmr.msra.gmra.mrb[28].mxu0 %vm1048_vm3, %v2482_v28  ;;  %5795 = vmatprep.subr.bf16.mxu1 %v6356_v8 }
 0x4e9   : > { %5779 = vmatpush3.bf16.xpose.msk.msra.mxu0 %vm6837_vm4, %v5777_v11  ;;  %5468 = vmatprep.mubr.msk.f32.mxu0 %vm6359_vm8, %v6360_v49  ;;  %v2877_v36 = vpop.permute.xlu0 %2876 }
 0x4ea   : > { %5784 = vmatprep.subr.bf16.mxu0 %v6356_v8 }
 0x4ee   : > { %5490 = vmatmul.mubr.msk.f32.vlgmr.msra.gmra.mrb[44].mxu1 %vm1048_vm3, %v2877_v36 }
 0x4ef   : > { %5503 = vmatprep.mubr.msk.f32.mxu1 %vm6359_vm8, %v6360_v49 }
 0x4f0   : > { %5469 = vmatmul.mubr.msk.f32.vlgmr.msra.gmra.mrb[30].mxu0 %vm1048_vm3, %v2640_v37 }
 0x4f1   : > { %5787 = vmatpush3.bf16.xpose.msk.msra.mxu0 %vm6837_vm4, %v5785_v29  ;;  %5482 = vmatprep.mubr.msk.f32.mxu0 %vm6359_vm8, %v6360_v49  ;;  %vm4651_vm4 = vcmask 261120  }
 0x4f2   : > { %5792 = vmatprep.subr.bf16.mxu0 %v6356_v8 }
 0x4f8   : > { %5483 = vmatmul.mubr.msk.f32.vlgmr.msra.gmra.mrb[32].mxu0 %vm1048_vm3, %v2798_v40 }
 0x4f9   : > { %5496 = vmatprep.mubr.msk.f32.mxu0 %vm6359_vm8, %v6360_v49 }
 0x531   : > { %v5358_v30 = vpop.f32.mrb[0].mxu0 }
 0x532   : > { %v5796_v3 = vpack.c.bf16 %v5358_v30, %v1676_v58  ;;  %4300 = vrot.lane.b32.xlu0 %v5358_v30, %s6361_s28  ;;  %v1548_v44 = vpop.f32.mrb[1].mxu0 }
 0x533   : > { %v5793_v12 = vpack.c.bf16 %v1548_v44, %v1675_v31  ;;  %4298 = vrot.lane.b32.xlu1 %v1548_v44, %s6361_s28 }
 0x534   : > { %5797 = vmatpush3.bf16.msra.mxu1 %v5796_v3 }
 0x535   : > { %v7307_v21 = vpop.f32.mrb[2].mxu0  ;;  %5794 = vmatpush3.bf16.msra.mxu0 %v5793_v12  ;;  %5801 = vmatprep.subr.bf16.mxu1 %v6356_v8 }
 0x536   : > { %4304 = vrot.lane.b32.xlu0 %v7307_v21, %s6361_s28  ;;  %v7312_v42 = vpop.f32.mrb[3].mxu0  ;;  %5798 = vmatprep.subr.bf16.mxu0 %v6356_v8 }
 0x537   : > { %4302 = vrot.lane.b32.xlu1 %v7312_v42, %s6361_s28 }
 0x539   : > { %v7317_v39 = vpop.f32.mrb[4].mxu0 }
 0x53a   : > { %4308 = vrot.lane.b32.xlu0 %v7317_v39, %s6361_s28  ;;  %v7321_v51 = vpop.f32.mrb[5].mxu0 }
 0x53b   : > { %4306 = vrot.lane.b32.xlu1 %v7321_v51, %s6361_s28 }
 0x53e   : > { %v7325_v55 = vpop.f32.mrb[6].mxu0 }
 0x53f   : > { %4312 = vrot.lane.b32.xlu0 %v7325_v55, %s6361_s28  ;;  %v7329_v33 = vpop.f32.mrb[7].mxu0 }
 0x540   : > { %4310 = vrot.lane.b32.xlu1 %v7329_v33, %s6361_s28 }
 0x567   : > { %v7333_v47 = vpop.f32.mrb[8].mxu0 }
 0x568   : > { %4316 = vrot.lane.b32.xlu0 %v7333_v47, %s6361_s28  ;;  %v7337_v0 = vpop.f32.mrb[9].mxu0 }
 0x569   : > { %4314 = vrot.lane.b32.xlu1 %v7337_v0, %s6361_s28 }
 0x56b   : > { %v7341_v59 = vpop.f32.mrb[10].mxu0 }
 0x56c   : > { %4320 = vrot.lane.b32.xlu0 %v7341_v59, %s6361_s28  ;;  %v7345_v5 = vpop.f32.mrb[11].mxu0 }
 0x56d   : > { %4318 = vrot.lane.b32.xlu1 %v7345_v5, %s6361_s28 }
 0x57f   : > { %v7349_v53 = vpop.f32.mrb[12].mxu0 }
 0x580   : > { %4324 = vrot.lane.b32.xlu0 %v7349_v53, %s6361_s28  ;;  %v7353_v7 = vpop.f32.mrb[13].mxu0 }
 0x581   : > { %4322 = vrot.lane.b32.xlu1 %v7353_v7, %s6361_s28 }
 0x587   : > { %v7357_v54 = vpop.f32.mrb[14].mxu0 }
 0x588   : > { %4328 = vrot.lane.b32.xlu0 %v7357_v54, %s6361_s28  ;;  %v7361_v61 = vpop.f32.mrb[15].mxu0 }
 0x589   : > { %4326 = vrot.lane.b32.xlu1 %v7361_v61, %s6361_s28 }
 0x58b   : > { %v1766_v15 = vpop.f32.mrb[16].mxu0 }
 0x58c   : > { %v5386_v34 = vpop.f32.mrb[17].mxu0  ;;  %v7375_v19 = vmul.f32 0.25, %v1766_v15 }
 0x58e   : > { %v2971_v3 = vsel %vm1048_vm3, %v7375_v19, -inf }
 0x591   : > { %v2003_v62 = vpop.f32.mrb[32].mxu1 }
 0x592   : > { %v5407_v63 = vpop.f32.mrb[33].mxu1  ;;  %v7373_v17 = vmul.f32 0.25, %v2003_v62 }
 0x593   : > { %v1845_v2 = vpop.f32.mrb[18].mxu0 }
 0x594   : > { %v5393_v45 = vpop.f32.mrb[19].mxu0  ;;  %v7365_v4 = vmul.f32 0.25, %v1845_v2  ;;  %v2974_v52 = vsel %vm1048_vm3, %v7373_v17, -inf }
 0x596   : > { %v2972_v10 = vsel %vm1048_vm3, %v7365_v4, -inf }
 0x599   : > { %v2161_v18 = vpop.f32.mrb[34].mxu1 }
 0x59a   : > { %v7367_v50 = vmul.f32 0.25, %v2161_v18  ;;  %v5421_v22 = vpop.f32.mrb[35].mxu1 }
 0x59b   : > { %v1924_v27 = vpop.f32.mrb[20].mxu0 }
 0x59c   : > { %v2977_v6 = vsel %vm1048_vm3, %v7367_v50, -inf  ;;  %v5400_v13 = vpop.f32.mrb[21].mxu0  ;;  %v7402_v2 = vmul.f32 0.25, %v1924_v27 }
 0x59d   : > { %v2978_v24 = vmax.f32 %v2972_v10, %v2977_v6 }
 0x5a1   : > { %v2319_v28 = vpop.f32.mrb[36].mxu1 }
 0x5a2   : > { %v7377_v20 = vmul.f32 0.25, %v2319_v28  ;;  %v5435_v23 = vpop.f32.mrb[37].mxu1 }
 0x5a3   : > { %v2082_v11 = vpop.f32.mrb[22].mxu0  ;;  %v2973_v23 = vsel %vm1048_vm3, %v7402_v2, -inf }
 0x5a4   : > { %v2981_v36 = vsel %vm1048_vm3, %v7377_v20, -inf  ;;  %v7383_v29 = vmul.f32 0.25, %v2082_v11  ;;  %v4301_v37 = vpop.permute.xlu0 %4300  ;;  %v5414_v40 = vpop.f32.mrb[23].mxu0 }
 0x5a5   : > { %v2982_v58 = vmax.f32 %v2974_v52, %v2981_v36  ;;  %v4347_v31 = vsel %vm1048_vm3, %v7144_v38, %v4301_v37  ;;  %v4299_v30 = vpop.permute.xlu1 %4298 }
 0x5a6   : > { %v2975_v44 = vsel %vm1048_vm3, %v7383_v29, -inf  ;;  %4653 = vst.msk [vmem:[%s7392_s30 + $0x8] sm:$0xff] %vm4651_vm4, %v4347_v31  ;;  %v4346_v12 = vsel %vm1048_vm3, %v7128_v25, %v4299_v30 }
 0x5a7   : > { %v2976_v15 = vmax.f32 %v2971_v3, %v2975_v44  ;;  %4652 = vst.msk [vmem:[%s7392_s30] sm:$0xff] %vm4651_vm4, %v4346_v12 }
 0x5a8   : > { %v4305_v38 = vpop.permute.xlu0 %4304 }
 0x5a9   : > { %v4349_v34 = vsel %vm1048_vm3, %v7151_v26, %v4305_v38  ;;  %v4303_v62 = vpop.permute.xlu1 %4302  ;;  %v2477_v63 = vpop.f32.mrb[38].mxu1 }
 0x5aa   : > { %4655 = vst.msk [vmem:[%s7392_s30 + $0x18] sm:$0xff] %vm4651_vm4, %v4349_v34  ;;  %v4348_v45 = vsel %vm1048_vm3, %v7149_v56, %v4303_v62  ;;  %v7408_v18 = vmul.f32 0.25, %v2477_v63  ;;  %v5449_v25 = vpop.f32.mrb[39].mxu1 }
 0x5ab   : > { %4654 = vst.msk [vmem:[%s7392_s30 + $0x10] sm:$0xff] %vm4651_vm4, %v4348_v45  ;;  %v2240_v22 = vpop.f32.mrb[24].mxu0 }
 0x5ac   : > { %v2985_v26 = vsel %vm1048_vm3, %v7408_v18, -inf  ;;  %v7414_v10 = vmul.f32 0.25, %v2240_v22  ;;  %v4309_v27 = vpop.permute.xlu0 %4308  ;;  %v5428_v6 = vpop.f32.mrb[25].mxu0 }
 0x5ad   : > { %v2986_v13 = vmax.f32 %v2978_v24, %v2985_v26  ;;  %v4351_v28 = vsel %vm1048_vm3, %v7170_v43, %v4309_v27  ;;  %v4307_v56 = vpop.permute.xlu1 %4306 }
 0x5ae   : > { %v2979_v11 = vsel %vm1048_vm3, %v7414_v10, -inf  ;;  %4657 = vst.msk [vmem:[%s7392_s30 + $0x28] sm:$0xff] %vm4651_vm4, %v4351_v28  ;;  %v4350_v52 = vsel %vm1048_vm3, %v7160_v46, %v4307_v56 }
 0x5af   : > { %v2980_v36 = vmax.f32 %v2973_v23, %v2979_v11  ;;  %4656 = vst.msk [vmem:[%s7392_s30 + $0x20] sm:$0xff] %vm4651_vm4, %v4350_v52 }
 0x5b1   : > { %v2635_v24 = vpop.f32.mrb[40].mxu1  ;;  %v4313_v37 = vpop.permute.xlu0 %4312 }
 0x5b2   : > { %v7428_v40 = vmul.f32 0.25, %v2635_v24  ;;  %v4353_v43 = vsel %vm1048_vm3, %v7188_v48, %v4313_v37  ;;  %v5463_v31 = vpop.f32.mrb[41].mxu1  ;;  %v4311_v30 = vpop.permute.xlu1 %4310 }
 0x5b3   : > { %4659 = vst.msk [vmem:[%s7392_s30 + $0x38] sm:$0xff] %vm4651_vm4, %v4353_v43  ;;  %v4352_v3 = vsel %vm1048_vm3, %v7166_v32, %v4311_v30  ;;  %v2398_v44 = vpop.f32.mrb[26].mxu0 }
 0x5b4   : > { %v2989_v46 = vsel %vm1048_vm3, %v7428_v40, -inf  ;;  %4658 = vst.msk [vmem:[%s7392_s30 + $0x30] sm:$0xff] %vm4651_vm4, %v4352_v3  ;;  %v7440_v12 = vmul.f32 0.25, %v2398_v44  ;;  %v5442_v38 = vpop.f32.mrb[27].mxu0 }
 0x5b5   : > { %v2990_v34 = vmax.f32 %v2982_v58, %v2989_v46 }
 0x5b6   : > { %v2983_v48 = vsel %vm1048_vm3, %v7440_v12, -inf }
 0x5b7   : > { %v2984_v62 = vmax.f32 %v2976_v15, %v2983_v48 }
 0x5b9   : > { %v2793_v63 = vpop.f32.mrb[42].mxu1 }
 0x5ba   : > { %v7444_v45 = vmul.f32 0.25, %v2793_v63  ;;  %v5477_v25 = vpop.f32.mrb[43].mxu1 }
 0x5bb   : > { %v2556_v22 = vpop.f32.mrb[28].mxu0 }
 0x5bc   : > { %v2993_v32 = vsel %vm1048_vm3, %v7444_v45, -inf  ;;  %v7448_v26 = vmul.f32 0.25, %v2556_v22  ;;  %v5456_v27 = vpop.f32.mrb[29].mxu0 }
 0x5bd   : > { %v2994_v6 = vmax.f32 %v2986_v13, %v2993_v32 }
 0x5be   : > { %v2987_v28 = vsel %vm1048_vm3, %v7448_v26, -inf }
 0x5bf   : > { %v2988_v58 = vmax.f32 %v2980_v36, %v2987_v28 }
 0x5c1   : > { %v2951_v56 = vpop.f32.mrb[44].mxu1 }
 0x5c2   : > { %v7452_v23 = vmul.f32 0.25, %v2951_v56  ;;  %v5491_v15 = vpop.f32.mrb[45].mxu1 }
 0x5c3   : > { %v2714_v11 = vpop.f32.mrb[30].mxu0 }
 0x5c4   : > { %v2997_v52 = vsel %vm1048_vm3, %v7452_v23, -inf  ;;  %v7456_v24 = vmul.f32 0.25, %v2714_v11  ;;  %v5470_v37 = vpop.f32.mrb[31].mxu0 }
 0x5c5   : > { %v2998_v43 = vmax.f32 %v2990_v34, %v2997_v52 }
 0x5c6   : > { %v2991_v31 = vsel %vm1048_vm3, %v7456_v24, -inf }
 0x5c7   : > { %v2992_v13 = vmax.f32 %v2984_v62, %v2991_v31 }
 0x5c9   : > { %v2999_v30 = vmax.f32 %v2992_v13, %v2994_v6 }
 0x5cb   : > { %v2872_v3 = vpop.f32.mrb[32].mxu0 }
 0x5cc   : > { %v7460_v44 = vmul.f32 0.25, %v2872_v3  ;;  %v5484_v36 = vpop.f32.mrb[33].mxu0 }
 0x5ce   : > { %v2995_v46 = vsel %vm1048_vm3, %v7460_v44, -inf }
 0x5cf   : > { %v2996_v38 = vmax.f32 %v2988_v58, %v2995_v46 }
 0x5d1   : > { %v3000_v48 = vmax.f32 %v2996_v38, %v2998_v43 }
 0x5d3   : > { %v7464_v63 = vmax.f32 %v2999_v30, %v3000_v48 }
 0x5d5   : > { %v3002_v25 = vsub.f32 %v7375_v19, %v7464_v63  ;;  %v3003_v34 = vsub.f32 %v7365_v4, %v7464_v63  ;;  %v3004_v62 = vsub.f32 %v7402_v2, %v7464_v63  ;;  %v3005_v22 = vsub.f32 %v7373_v17, %v7464_v63 }
 0x5d6   : > { %v3006_v32 = vsub.f32 %v7383_v29, %v7464_v63  ;;  %v3007_v27 = vsub.f32 %v7367_v50, %v7464_v63  ;;  %v3008_v6 = vsub.f32 %v7414_v10, %v7464_v63  ;;  %v3009_v19 = vsub.f32 %v7377_v20, %v7464_v63 }
 0x5d7   : > { %v3010_v4 = vsub.f32 %v7440_v12, %v7464_v63  ;;  %v3011_v2 = vsub.f32 %v7408_v18, %v7464_v63  ;;  %v3012_v17 = vsub.f32 %v7448_v26, %v7464_v63  ;;  %v3013_v29 = vsub.f32 %v7428_v40, %v7464_v63 }
 0x5d8   : > { %v3014_v50 = vsub.f32 %v7456_v24, %v7464_v63  ;;  %v3015_v10 = vsub.f32 %v7444_v45, %v7464_v63  ;;  %v3016_v20 = vsub.f32 %v7460_v44, %v7464_v63  ;;  %v3017_v12 = vsub.f32 %v7452_v23, %v7464_v63 }
 0x5d9   : > { %v3018_v18 = vmul.f32 1.442695, %v3002_v25  ;;  %v3020_v28 = vmul.f32 1.442695, %v3003_v34  ;;  %v3022_v26 = vmul.f32 1.442695, %v3004_v62 }
 0x5da   : > { %v3024_v58 = vmul.f32 1.442695, %v3005_v22  ;;  %v4317_v56 = vpop.permute.xlu0 %4316  ;;  %v3026_v15 = vmul.f32 1.442695, %v3006_v32  ;;  %v3028_v45 = vmul.f32 1.442695, %v3007_v27 }
 0x5db   : > { %6072 = vpow2.f32 %v3018_v18  ;;  %v4315_v40 = vpop.permute.xlu1 %4314  ;;  %v4355_v11 = vsel %vm1048_vm3, %v7208_v9, %v4317_v56  ;;  %v3030_v43 = vmul.f32 1.442695, %v3008_v6  ;;  %v3034_v9 = vmul.f32 1.442695, %v3010_v4 }
 0x5dc   : > { %6074 = vpow2.f32 %v3020_v28  ;;  %v4354_v23 = vsel %vm1048_vm3, %v7195_v16, %v4315_v40  ;;  %4661 = vst.msk [vmem:[%s7392_s30 + $0x48] sm:$0xff] %vm4651_vm4, %v4355_v11  ;;  %v3032_v16 = vmul.f32 1.442695, %v3009_v19  ;;  %v3038_v46 = vmul.f32 1.442695, %v3012_v17 }
 0x5dd   : > { %6076 = vpow2.f32 %v3022_v26  ;;  %4660 = vst.msk [vmem:[%s7392_s30 + $0x40] sm:$0xff] %vm4651_vm4, %v4354_v23  ;;  %v3040_v25 = vmul.f32 1.442695, %v3013_v29  ;;  %v3042_v32 = vmul.f32 1.442695, %v3014_v50 }
 0x5de   : > { %6078 = vpow2.f32 %v3024_v58  ;;  %v4321_v52 = vpop.permute.xlu0 %4320  ;;  %v3044_v4 = vmul.f32 1.442695, %v3015_v10  ;;  %v3046_v18 = vmul.f32 1.442695, %v3016_v20  ;;  %v3048_v58 = vmul.f32 1.442695, %v3017_v12 }
 0x5df   : > { %v4357_v24 = vsel %vm1048_vm3, %v7228_v1, %v4321_v52  ;;  %v4319_v37 = vpop.permute.xlu1 %4318  ;;  %6080 = vpow2.f32 %v3026_v15  ;;  %v3036_v1 = vmul.f32 1.442695, %v3011_v2 }
 0x5e0   : > { %4663 = vst.msk [vmem:[%s7392_s30 + $0x58] sm:$0xff] %vm4651_vm4, %v4357_v24  ;;  %v4356_v31 = vsel %vm1048_vm3, %v7224_v57, %v4319_v37  ;;  %6082 = vpow2.f32 %v3028_v45 }
 0x5e1   : > { %4662 = vst.msk [vmem:[%s7392_s30 + $0x50] sm:$0xff] %vm4651_vm4, %v4356_v31  ;;  %6084 = vpow2.f32 %v3030_v43 }
 0x5e2   : > { %6086 = vpow2.f32 %v3032_v16 }
 0x5e3   : > { %6088 = vpow2.f32 %v3034_v9 }
 0x5e4   : > { %6090 = vpow2.f32 %v3036_v1 }
 0x5e5   : > { %v7514_v13 = vpop.eup %6072  ;;  %6092 = vpow2.f32 %v3038_v46 }
 0x5e6   : > { %v7516_v30 = vpop.eup %6074  ;;  %v3050_v3 = vsel %vm1048_vm3, %v7514_v13, 0.0  ;;  %6094 = vpow2.f32 %v3040_v25 }
 0x5e7   : > { %v7520_v44 = vpop.eup %6076  ;;  %v3051_v57 = vsel %vm1048_vm3, %v7516_v30, 0.0  ;;  %6096 = vpow2.f32 %v3042_v32 }
 0x5e8   : > { %v7524_v36 = vpop.eup %6078  ;;  %v3052_v38 = vadd.f32 %v3051_v57, %v3050_v3  ;;  %v3053_v48 = vsel %vm1048_vm3, %v7520_v44, 0.0  ;;  %6098 = vpow2.f32 %v3044_v4 }
 0x5e9   : > { %v7528_v63 = vpop.eup %6080  ;;  %v3055_v62 = vsel %vm1048_vm3, %v7524_v36, 0.0  ;;  %6100 = vpow2.f32 %v3046_v18  ;;  %v1677_v18 = vld [vmem:[%s6675_s9 + $0x10] sm:$0xff] }
 0x5ea   : > { %v3054_v34 = vadd.f32 %v3053_v48, %v3052_v38  ;;  %v7532_v22 = vpop.eup %6082  ;;  %v3057_v6 = vsel %vm1048_vm3, %v7528_v63, 0.0  ;;  %6102 = vpow2.f32 %v3048_v58  ;;  %v5799_v58 = vpack.c.bf16 %v7312_v42, %v1677_v18 }
 0x5eb   : > { %v7536_v19 = vpop.eup %6084  ;;  %v3059_v17 = vsel %vm1048_vm3, %v7532_v22, 0.0 }
 0x5ec   : > { %v3056_v27 = vadd.f32 %v3055_v62, %v3054_v34  ;;  %v6087_v29 = vpop.eup %6086  ;;  %v3061_v50 = vsel %vm1048_vm3, %v7536_v19, 0.0 }
 0x5ed   : > { %v6089_v26 = vpop.eup %6088  ;;  %v3063_v10 = vsel %vm1048_vm3, %v6087_v29, 0.0 }
 0x5ee   : > { %v3058_v2 = vadd.f32 %v3057_v6, %v3056_v27  ;;  %v6091_v11 = vpop.eup %6090  ;;  %v3065_v52 = vsel %vm1048_vm3, %v6089_v26, 0.0 }
 0x5ef   : > { %v6093_v12 = vpop.eup %6092 }
 0x5f0   : > { %v3060_v28 = vadd.f32 %v3059_v17, %v3058_v2  ;;  %v6095_v37 = vpop.eup %6094  ;;  %v3069_v31 = vsel %vm1048_vm3, %v6093_v12, 0.0 }
 0x5f1   : > { %v6097_v16 = vpop.eup %6096 }
 0x5f2   : > { %v3062_v56 = vadd.f32 %v3061_v50, %v3060_v28  ;;  %v4325_v40 = vpop.permute.xlu0 %4324  ;;  %v6099_v46 = vpop.eup %6098  ;;  %v3073_v25 = vsel %vm1048_vm3, %v6097_v16, 0.0 }
 0x5f3   : > { %v4359_v15 = vsel %vm1048_vm3, %v7246_v60, %v4325_v40  ;;  %v4323_v45 = vpop.permute.xlu1 %4322  ;;  %v3067_v60 = vsel %vm1048_vm3, %v6091_v11, 0.0  ;;  %v6101_v34 = vpop.eup %6100  ;;  %v3075_v32 = vsel %vm1048_vm3, %v6099_v46, 0.0 }
 0x5f4   : > { %v3064_v23 = vadd.f32 %v3063_v10, %v3062_v56  ;;  %4665 = vst.msk [vmem:[%s7392_s30 + $0x68] sm:$0xff] %vm4651_vm4, %v4359_v15  ;;  %v4358_v20 = vsel %vm1048_vm3, %v7253_v35, %v4323_v45  ;;  %v3071_v35 = vsel %vm1048_vm3, %v6095_v37, 0.0  ;;  %v6103_v27 = vpop.eup %6102  ;;  %v3077_v6 = vsel %vm1048_vm3, %v6101_v34, 0.0 }
 0x5f5   : > { %4664 = vst.msk [vmem:[%s7392_s30 + $0x60] sm:$0xff] %vm4651_vm4, %v4358_v20  ;;  %v3079_v2 = vsel %vm1048_vm3, %v6103_v27, 0.0 }
 0x5f6   : > { %v3066_v24 = vadd.f32 %v3065_v52, %v3064_v23 }
 0x5f8   : > { %v3068_v43 = vadd.f32 %v3067_v60, %v3066_v24  ;;  %v1680_v24 = vld [vmem:[%s6675_s9 + $0x28] sm:$0xff]  ;;  %v1679_v60 = vld [vmem:[%s6675_s9 + $0x20] sm:$0xff] }
 0x5fa   : > { %v3070_v9 = vadd.f32 %v3069_v31, %v3068_v43  ;;  %v4329_v1 = vpop.permute.xlu0 %4328  ;;  %v1686_v43 = vld [vmem:[%s6675_s9 + $0x58] sm:$0xff]  ;;  %v1685_v31 = vld [vmem:[%s6675_s9 + $0x50] sm:$0xff] }
 0x5fb   : > { %v4361_v3 = vsel %vm1048_vm3, %v7266_v14, %v4329_v1  ;;  %v4327_v57 = vpop.permute.xlu1 %4326  ;;  %v1690_v1 = vld [vmem:[%s6675_s9 + $0x78] sm:$0xff] }
 0x5fc   : > { %v3072_v38 = vadd.f32 %v3071_v35, %v3070_v9  ;;  %4667 = vst.msk [vmem:[%s7392_s30 + $0x78] sm:$0xff] %vm4651_vm4, %v4361_v3  ;;  %v4360_v48 = vsel %vm1048_vm3, %v7282_v41, %v4327_v57  ;;  %v1678_v41 = vld [vmem:[%s6675_s9 + $0x18] sm:$0xff]  ;;  %v1687_v9 = vld [vmem:[%s6675_s9 + $0x60] sm:$0xff]  ;;  %v1689_v35 = vld [vmem:[%s6675_s9 + $0x70] sm:$0xff] }
 0x5fd   : > { %4666 = vst.msk [vmem:[%s7392_s30 + $0x70] sm:$0xff] %vm4651_vm4, %v4360_v48  ;;  %v5802_v50 = vpack.c.bf16 %v7307_v21, %v1678_v41  ;;  %v4362_v3 = vld [vmem:[%s7887_s6] sm:$0xff]  ;;  %v5835_v57 = vpack.c.bf16 %v7361_v61, %v1689_v35 }
 0x5fe   : > { %v3074_v62 = vadd.f32 %v3073_v25, %v3072_v38 }
 0x600   : > { %v3076_v14 = vadd.f32 %v3075_v32, %v3074_v62 }
 0x602   : > { %v3078_v4 = vadd.f32 %v3077_v6, %v3076_v14 }
 0x604   : > { %v3080_v17 = vadd.f32 %v3079_v2, %v3078_v4 }
 0x606   : > { %6104 = vrcp.f32 %v3080_v17 }
 0x610   : > { %v6105_v28 = vpop.eup %6104 }
 0x611   : > { %v3082_v56 = vmul.f32 %v6105_v28, %v7514_v13  ;;  %v3083_v40 = vmul.f32 %v6105_v28, %v7516_v30  ;;  %v3084_v10 = vmul.f32 %v6105_v28, %v7520_v44  ;;  %v3085_v15 = vmul.f32 %v6105_v28, %v7524_v36 }
 0x612   : > { %v3086_v45 = vmul.f32 %v6105_v28, %v7528_v63  ;;  %v3087_v23 = vmul.f32 %v6105_v28, %v7532_v22  ;;  %v3088_v20 = vmul.f32 %v6105_v28, %v7536_v19  ;;  %v3089_v52 = vmul.f32 %v6105_v28, %v6087_v29 }
 0x613   : > { %5497 = vmatmul.mubr.msk.f32.vlgmr.msra.gmra.mrb[34].mxu0 %vm1048_vm3, %v3082_v56  ;;  %5504 = vmatmul.mubr.msk.f32.vlgmr.msra.gmra.mrb[46].mxu1 %vm1048_vm3, %v3083_v40  ;;  %v3090_v21 = vmul.f32 %v6105_v28, %v6089_v26  ;;  %v3091_v42 = vmul.f32 %v6105_v28, %v6091_v11  ;;  %v7582_v13 = vmul.f32 %v6105_v28, %v6093_v12  ;;  %v1682_v26 = vld [vmem:[%s6675_s9 + $0x38] sm:$0xff]  ;;  %v1681_v11 = vld [vmem:[%s6675_s9 + $0x30] sm:$0xff]  ;;  %v1684_v12 = vld [vmem:[%s6675_s9 + $0x48] sm:$0xff] }
 0x614   : > { %5800 = vmatpush3.bf16.msra.mxu0 %v5799_v58  ;;  %5803 = vmatpush3.bf16.msra.mxu1 %v5802_v50  ;;  %v3093_v30 = vmul.f32 %v6105_v28, %v6095_v37  ;;  %v7584_v44 = vmul.f32 %v6105_v28, %v6097_v16  ;;  %v7586_v36 = vmul.f32 %v6105_v28, %v6099_v46  ;;  %v1683_v37 = vld [vmem:[%s6675_s9 + $0x40] sm:$0xff]  ;;  %v1688_v16 = vld [vmem:[%s6675_s9 + $0x68] sm:$0xff]  ;;  %s4703_s9 = sshll.u32 %s7392_s30, 4  ;;  %s7704_s9 = int_to_ptr.vmem [resolvable:$true] %s4703_s9 }
 0x615   : > { %5510 = vmatprep.mubr.msk.f32.mxu0 %vm6359_vm8, %v6360_v49  ;;  %5517 = vmatprep.mubr.msk.f32.mxu1 %vm6359_vm8, %v6360_v49  ;;  %v7592_v63 = vmul.f32 %v6105_v28, %v6101_v34  ;;  %v7594_v22 = vmul.f32 %v6105_v28, %v6103_v27  ;;  %v5808_v19 = vpack.c.bf16 %v7317_v39, %v1680_v24  ;;  %s6240_s13 = scalar_lea.vmem %s7704_s9, 2048  ;;  %p6247_p3 = scmp.lt.s32.totalorder %s7704_s9, %s6245_s10 }
 0x616   : > { %v5805_v29 = vpack.c.bf16 %v7321_v51, %v1679_v60  ;;  %5804 = vmatprep.subr.bf16.mxu0 %v6356_v8  ;;  %5807 = vmatprep.subr.bf16.mxu1 %v6356_v8  ;;  %v5814_v39 = vpack.c.bf16 %v7325_v55, %v1682_v26  ;;  %v5811_v51 = vpack.c.bf16 %v7329_v33, %v1681_v11  ;;  %p6241_p2 = scmp.ne.s32.totalorder %s7704_s9, %s6240_s13  ;;  %p6248_p9 = scmp.lt.s32.totalorder %s6246_s15, %s6240_s13 }
 0x617   : > { %5511 = vmatmul.mubr.msk.f32.vlgmr.msra.gmra.mrb[36].mxu0 %vm1048_vm3, %v3084_v10  ;;  %5518 = vmatmul.mubr.msk.f32.vlgmr.msra.gmra.mrb[48].mxu1 %vm1048_vm3, %v3085_v15  ;;  %v5820_v55 = vpack.c.bf16 %v7333_v47, %v1684_v12  ;;  %v5817_v33 = vpack.c.bf16 %v7337_v0, %v1683_v37  ;;  %v5826_v47 = vpack.c.bf16 %v7341_v59, %v1686_v43 }
 0x618   : > { %5806 = vmatpush3.bf16.msra.mxu0 %v5805_v29  ;;  %5809 = vmatpush3.bf16.msra.mxu1 %v5808_v19  ;;  %v5823_v0 = vpack.c.bf16 %v7345_v5, %v1685_v31  ;;  %v5832_v59 = vpack.c.bf16 %v7349_v53, %v1688_v16  ;;  %v5829_v5 = vpack.c.bf16 %v7353_v7, %v1687_v9  ;;  %v4363_v53 = vld [vmem:[%s7887_s6 + $0x8] sm:$0xff]  ;;  %p6242_p10 = pnand %p6241_p2, %p7953_p12  ;;  %p6249_p6 = por %p6248_p9, %p6247_p3 }
 0x619   : > { %5524 = vmatprep.mubr.msk.f32.mxu0 %vm6359_vm8, %v6360_v49  ;;  %5531 = vmatprep.mubr.msk.f32.mxu1 %vm6359_vm8, %v6360_v49  ;;  %v5838_v7 = vpack.c.bf16 %v7357_v54, %v1690_v1  ;;  %v5840_v46 = vpack.c.bf16 %v4363_v53, %v4362_v3 }
 0x61a   : > { %5810 = vmatprep.subr.bf16.mxu0 %v6356_v8  ;;  %5813 = vmatprep.subr.bf16.mxu1 %v6356_v8  ;;  %p6243_p13 = pneg %p6242_p10 }
 0x61b   : > { %5525 = vmatmul.mubr.msk.f32.vlgmr.msra.gmra.mrb[38].mxu0 %vm1048_vm3, %v3086_v45  ;;  %5532 = vmatmul.mubr.msk.f32.vlgmr.msra.gmra.mrb[50].mxu1 %vm1048_vm3, %v3087_v23 }
 0x61c   : > { %5812 = vmatpush3.bf16.msra.mxu0 %v5811_v51  ;;  %5815 = vmatpush3.bf16.msra.mxu1 %v5814_v39  ;;  %p6250_p4 = pnand %p6249_p6, %p6243_p13 }
 0x61d   : > { %5538 = vmatprep.mubr.msk.f32.mxu0 %vm6359_vm8, %v6360_v49  ;;  %5545 = vmatprep.mubr.msk.f32.mxu1 %vm6359_vm8, %v6360_v49 }
 0x61e   : > { %5816 = vmatprep.subr.bf16.mxu0 %v6356_v8  ;;  %5819 = vmatprep.subr.bf16.mxu1 %v6356_v8 }
 0x61f   : > { %5539 = vmatmul.mubr.msk.f32.vlgmr.msra.gmra.mrb[40].mxu0 %vm1048_vm3, %v3088_v20  ;;  %5546 = vmatmul.mubr.msk.f32.vlgmr.msra.gmra.mrb[52].mxu1 %vm1048_vm3, %v3089_v52 }
 0x620   : > { %5818 = vmatpush3.bf16.msra.mxu0 %v5817_v33  ;;  %5821 = vmatpush3.bf16.msra.mxu1 %v5820_v55 }
 0x621   : > { %5552 = vmatprep.mubr.msk.f32.mxu0 %vm6359_vm8, %v6360_v49  ;;  %5559 = vmatprep.mubr.msk.f32.mxu1 %vm6359_vm8, %v6360_v49 }
 0x622   : > { %5822 = vmatprep.subr.bf16.mxu0 %v6356_v8  ;;  %5825 = vmatprep.subr.bf16.mxu1 %v6356_v8 }
 0x623   : > { %5553 = vmatmul.mubr.msk.f32.vlgmr.msra.gmra.mrb[42].mxu0 %vm1048_vm3, %v3090_v21  ;;  %5560 = vmatmul.mubr.msk.f32.vlgmr.msra.gmra.mrb[54].mxu1 %vm1048_vm3, %v3091_v42 }
 0x624   : > { %5824 = vmatpush3.bf16.msra.mxu0 %v5823_v0  ;;  %5827 = vmatpush3.bf16.msra.mxu1 %v5826_v47 }
 0x625   : > { %5566 = vmatprep.mubr.msk.f32.mxu0 %vm6359_vm8, %v6360_v49  ;;  %5573 = vmatprep.mubr.msk.f32.mxu1 %vm6359_vm8, %v6360_v49 }
 0x626   : > { %5828 = vmatprep.subr.bf16.mxu0 %v6356_v8  ;;  %5831 = vmatprep.subr.bf16.mxu1 %v6356_v8 }
 0x627   : > { %5567 = vmatmul.mubr.msk.f32.vlgmr.msra.gmra.mrb[44].mxu0 %vm1048_vm3, %v7582_v13  ;;  %5574 = vmatmul.mubr.msk.f32.vlgmr.msra.gmra.mrb[56].mxu1 %vm1048_vm3, %v3093_v30 }
 0x628   : > { %5830 = vmatpush3.bf16.msra.mxu0 %v5829_v5  ;;  %5833 = vmatpush3.bf16.msra.mxu1 %v5832_v59 }
 0x629   : > { %5580 = vmatprep.mubr.msk.f32.mxu0 %vm6359_vm8, %v6360_v49  ;;  %5587 = vmatprep.mubr.msk.f32.mxu1 %vm6359_vm8, %v6360_v49 }
 0x62a   : > { %5834 = vmatprep.subr.bf16.mxu0 %v6356_v8  ;;  %5837 = vmatprep.subr.bf16.mxu1 %v6356_v8 }
 0x62b   : > { %5581 = vmatmul.mubr.msk.f32.vlgmr.msra.gmra.mrb[46].mxu0 %vm1048_vm3, %v7584_v44  ;;  %5588 = vmatmul.mubr.msk.f32.vlgmr.msra.gmra.mrb[58].mxu1 %vm1048_vm3, %v7586_v36 }
 0x62c   : > { %5836 = vmatpush3.bf16.msra.mxu0 %v5835_v57  ;;  %5839 = vmatpush3.bf16.msra.mxu1 %v5838_v7 }
 0x62d   : > { %5594 = vmatprep.mubr.msk.f32.mxu0 %vm6359_vm8, %v6360_v49  ;;  %5601 = vmatprep.mubr.msk.f32.mxu1 %vm6359_vm8, %v6360_v49 }
 0x62e   : > { %5841 = vmatprep.subr.bf16.mxu0 %v5840_v46 }
 0x62f   : > { %5595 = vmatmul.mubr.msk.f32.vlgmr.msra.gmra.mrb[48].mxu0 %vm1048_vm3, %v7592_v63  ;;  %5602 = vmatmul.mubr.msk.f32.vlgmr.msra.gmra.mrb[60].mxu1 %vm1048_vm3, %v7594_v22 }
 0x630   : > { %5843 = vmatpush3.bf16.msra.mxu0 %v5840_v46 }
 0x6e6   : > { %v3167_v8 = vpop.f32.mrb[34].mxu0  ;;  %v3240_v54 = vpop.f32.mrb[46].mxu1 }
 0x6e7   : > { %v5498_v61 = vpop.f32.mrb[35].mxu0  ;;  %v5505_v38 = vpop.f32.mrb[47].mxu1  ;;  %5608 = vmatprep.mubr.msk.f32.mxu0 %vm1048_vm3, %v3167_v8 }
 0x6e8   : > { %5609 = vmatmul.mubr.msk.f32.vlgmr.msra.gmra.mrb[50].mxu0 %vm1048_vm3, %v3240_v54 }
 0x6ea   : > { %v3313_v48 = vpop.f32.mrb[36].mxu0  ;;  %v3386_v25 = vpop.f32.mrb[48].mxu1 }
 0x6eb   : > { %v5512_v34 = vpop.f32.mrb[37].mxu0  ;;  %v5519_v49 = vpop.f32.mrb[49].mxu1  ;;  %5611 = vmatprep.mubr.msk.f32.mxu0 %vm1048_vm3, %v3313_v48 }
 0x6ec   : > { %5612 = vmatmul.mubr.msk.f32.gmra.mrb[52].mxu0 %vm1048_vm3, %v3386_v25 }
 0x6ee   : > { %v3459_v62 = vpop.f32.mrb[38].mxu0  ;;  %v3532_v32 = vpop.f32.mrb[50].mxu1 }
 0x6ef   : > { %v5526_v27 = vpop.f32.mrb[39].mxu0  ;;  %v5533_v14 = vpop.f32.mrb[51].mxu1  ;;  %5614 = vmatprep.mubr.msk.f32.mxu0 %vm1048_vm3, %v3459_v62 }
 0x6f0   : > { %5615 = vmatmul.mubr.msk.f32.gmra.mrb[54].mxu0 %vm1048_vm3, %v3532_v32 }
 0x6f2   : > { %v3605_v6 = vpop.f32.mrb[40].mxu0  ;;  %v3678_v4 = vpop.f32.mrb[52].mxu1 }
 0x6f3   : > { %v5540_v2 = vpop.f32.mrb[41].mxu0  ;;  %v5547_v17 = vpop.f32.mrb[53].mxu1  ;;  %5617 = vmatprep.mubr.msk.f32.mxu0 %vm1048_vm3, %v3605_v6 }
 0x6f4   : > { %5618 = vmatmul.mubr.msk.f32.gmra.mrb[56].mxu0 %vm1048_vm3, %v3678_v4 }
 0x6f6   : > { %v3751_v41 = vpop.f32.mrb[42].mxu0  ;;  %v3824_v18 = vpop.f32.mrb[54].mxu1 }
 0x6f7   : > { %v5554_v28 = vpop.f32.mrb[43].mxu0  ;;  %v5561_v50 = vpop.f32.mrb[55].mxu1  ;;  %5620 = vmatprep.mubr.msk.f32.mxu0 %vm1048_vm3, %v3751_v41 }
 0x6f8   : > { %5621 = vmatmul.mubr.msk.f32.gmra.mrb[58].mxu0 %vm1048_vm3, %v3824_v18 }
 0x6fa   : > { %v3897_v58 = vpop.f32.mrb[44].mxu0  ;;  %v3970_v56 = vpop.f32.mrb[56].mxu1 }
 0x6fb   : > { %v5568_v40 = vpop.f32.mrb[45].mxu0  ;;  %v5575_v10 = vpop.f32.mrb[57].mxu1  ;;  %5623 = vmatprep.mubr.msk.f32.mxu0 %vm1048_vm3, %v3897_v58 }
 0x6fc   : > { %5624 = vmatmul.mubr.msk.f32.gmra.mrb[60].mxu0 %vm1048_vm3, %v3970_v56 }
 0x6fe   : > { %v4043_v15 = vpop.f32.mrb[46].mxu0  ;;  %v4116_v45 = vpop.f32.mrb[58].mxu1 }
 0x6ff   : > { %v5582_v23 = vpop.f32.mrb[47].mxu0  ;;  %v5589_v20 = vpop.f32.mrb[59].mxu1  ;;  %5626 = vmatprep.mubr.msk.f32.mxu0 %vm1048_vm3, %v4043_v15 }
 0x700   : > { %5627 = vmatmul.mubr.msk.f32.gmra.mrb[62].mxu0 %vm1048_vm3, %v4116_v45 }
 0x702   : > { %v4189_v52 = vpop.f32.mrb[48].mxu0  ;;  %v4262_v24 = vpop.f32.mrb[60].mxu1 }
 0x703   : > { %v5596_v60 = vpop.f32.mrb[49].mxu0  ;;  %v5603_v21 = vpop.f32.mrb[61].mxu1  ;;  %5629 = vmatprep.mubr.msk.f32.mxu0 %vm1048_vm3, %v4189_v52 }
 0x704   : > { %5630 = vmatmul.mubr.msk.f32.gmra.mrb[64].mxu0 %vm1048_vm3, %v4262_v24 }
 0x705   : > { %6253 = shalt.err (!%p6250_p4)
}
 0x706   : > { %s6254_s17 = scalar_lea.hbm %s7701_s26, 2048  ;;  %s6258_s28 = scalar_lea.hbm %s7952_s11, 4096 }
 0x707   : > { %p6255_p7 = scmp.ne.s32.totalorder %s7701_s26, %s6254_s17  ;;  %p6259_p11 = scmp.lt.u32.totalorder %s7701_s26, %s7952_s11 }
 0x708   : > { %p6260_p0 = scmp.lt.u32.totalorder %s6258_s28, %s6254_s17  ;;  %p6262_p2 = scmp.lt.u32.totalorder %s6254_s17, %s7701_s26 }
 0x709   : > { %p6256_p5 = pnand %p6255_p7, %p7953_p12 }
 0x70a   : > { %p6261_p1 = por %p6260_p0, %p6259_p11 }
 0x70b   : > { %p6257_p8 = pneg %p6256_p5 }
 0x70c   : > { %p6263_p10 = por %p6262_p2, %p6261_p1 }
 0x70e   : > { %p6264_p13 = pnand %p6263_p10, %p6257_p8 }
 0x710   : > { %6267 = shalt.err (!%p6264_p13)
}
 0x711   : > { %s6363_s12 = smov 128   ;;  %s6364_s22 = smov 8   ;;  %v6106_v51 = vld [vmem:[%s6660_s1 + $0x8] sm:$0xff]  ;;  %v6107_v33 = vld [vmem:[%s6660_s1] sm:$0xff]  ;;  %v6108_v5 = vld [vmem:[%s6660_s1 + $0x18] sm:$0xff] }
 0x712   : > { %5855 = dma.vmem_to_hbm [thread:$0]  (%p7953_p12), %s7704_s9, 2048, %s7701_s26, %s4674_s19, %s6363_s12, %s6363_s12, %s6364_s22  }
 0x713   : > { %s7954_s0 = sld [smem:[#allocation27_spill]]  ;;  %s7955_s10 = sld [smem:[#allocation28_spill]]  ;;  %v6109_v53 = vld [vmem:[%s6660_s1 + $0x10] sm:$0xff]  ;;  %v6110_v48 = vld [vmem:[%s6660_s1 + $0x28] sm:$0xff]  ;;  %v6111_v62 = vld [vmem:[%s6660_s1 + $0x20] sm:$0xff] }
 0x714   : > { %s7753_s26 = scalar_lea.vmem [#allocation10], %s6656_s8  ;;  %v6112_v41 = vld [vmem:[%s6660_s1 + $0x38] sm:$0xff]  ;;  %v6113_v58 = vld [vmem:[%s6660_s1 + $0x30] sm:$0xff]  ;;  %v6114_v52 = vld [vmem:[%s6660_s1 + $0x48] sm:$0xff]  ;;  %s7956_s15 = sld [smem:[#allocation29_spill]] }
 0x715   : > { %s4687_s8 = sshll.u32 %s7753_s26, 4  ;;  %s4669_s16 = scalar_lea.sflag [#allocation4], %s6653_s18  ;;  %s7830_s8 = int_to_ptr.vmem [resolvable:$true] %s4687_s8 }
 0x716   : > { %s6268_s28 = scalar_lea.vmem %s7830_s8, 2048  ;;  %s6365_s29 = smov [#allocation10]  }
 0x717   : > { %p6269_p3 = scmp.ne.s32.totalorder %s7830_s8, %s6268_s28 }
 0x719   : > { %v7736_v42 = vld [vmem:[%s7954_s0] ss:$0 sm:$0xff]  ;;  %p6270_p9 = pnand %p6269_p3, %p7953_p12 }
 0x71a   : > { %v7741_v30 = vld [vmem:[%s7955_s10] ss:$0 sm:$0xff]  ;;  %s7957_s17 = smov %s7956_s15  ;;  %s7828_s23 = scalar_lea.hbm %s7956_s15, %s5024_s27 }
 0x71b   : > { %p6271_p6 = pneg %p6270_p9 }
 0x7bb   : > { %v5610_v13 = vpop.f32.mrb[50].mxu0 }
 0x7bc   : > { %v4491_v44 = vadd.f32 %v5610_v13, %v7736_v42  ;;  %v4485_v36 = vpop.f32.mrb[51].mxu0  ;;  %v6115_v13 = vld [vmem:[%s6660_s1 + $0x40] sm:$0xff] }
 0x7bd   : > { %v4486_v63 = vadd.f32 %v7736_v42, %v4485_v36 }
 0x7be   : > { %vm4566_vm3 = vcmp.ge.f32.partialorder %v4491_v44, 0.0  ;;  %v4588_v22 = vmul.f32 %v7741_v30, %v4491_v44 }
 0x7bf   : > { %vm4565_vm9 = vcmp.ge.f32.partialorder %v4486_v63, 0.0  ;;  %v4587_v19 = vmul.f32 %v7741_v30, %v4486_v63  ;;  %v5613_v29 = vpop.f32.mrb[52].mxu0 }
 0x7c0   : > { %v4604_v26 = vsel %vm4566_vm3, %v4491_v44, %v4588_v22  ;;  %v4501_v11 = vadd.f32 %v5613_v29, %v7736_v42  ;;  %v4495_v39 = vpop.f32.mrb[53].mxu0 }
 0x7c1   : > { %v4620_v12 = vadd.f32 %v6106_v51, %v4604_v26  ;;  %v4603_v37 = vsel %vm4565_vm9, %v4486_v63, %v4587_v19  ;;  %v4496_v55 = vadd.f32 %v7736_v42, %v4495_v39 }
 0x7c2   : > { %v4619_v43 = vadd.f32 %v6107_v33, %v4603_v37  ;;  %vm4568_vm10 = vcmp.ge.f32.partialorder %v4501_v11, 0.0  ;;  %v4590_v31 = vmul.f32 %v7741_v30, %v4501_v11  ;;  %v6117_v37 = vld [vmem:[%s6660_s1 + $0x50] sm:$0xff] }
 0x7c3   : > { %4636 = vst.msk [vmem:[%s7753_s26 + $0x8] sm:$0xff] %vm512_vm0, %v4620_v12  ;;  %vm4567_vm11 = vcmp.ge.f32.partialorder %v4496_v55, 0.0  ;;  %v4589_v47 = vmul.f32 %v7741_v30, %v4496_v55  ;;  %v5616_v0 = vpop.f32.mrb[54].mxu0 }
 0x7c4   : > { %4635 = vst.msk [vmem:[%s7753_s26] sm:$0xff] %vm512_vm0, %v4619_v43  ;;  %v4606_v16 = vsel %vm4568_vm10, %v4501_v11, %v4590_v31  ;;  %v4511_v9 = vadd.f32 %v5616_v0, %v7736_v42  ;;  %v4505_v59 = vpop.f32.mrb[55].mxu0  ;;  %v6116_v11 = vld [vmem:[%s6660_s1 + $0x58] sm:$0xff] }
 0x7c5   : > { %v4622_v1 = vadd.f32 %v6108_v5, %v4606_v16  ;;  %v4605_v35 = vsel %vm4567_vm11, %v4496_v55, %v4589_v47  ;;  %v4506_v3 = vadd.f32 %v7736_v42, %v4505_v59 }
 0x7c6   : > { %v4621_v7 = vadd.f32 %v6109_v53, %v4605_v35  ;;  %vm4570_vm12 = vcmp.ge.f32.partialorder %v4511_v9, 0.0  ;;  %v4592_v57 = vmul.f32 %v7741_v30, %v4511_v9  ;;  %v6119_v35 = vld [vmem:[%s6660_s1 + $0x60] sm:$0xff] }
 0x7c7   : > { %4638 = vst.msk [vmem:[%s7753_s26 + $0x18] sm:$0xff] %vm512_vm0, %v4622_v1  ;;  %vm4569_vm13 = vcmp.ge.f32.partialorder %v4506_v3, 0.0  ;;  %v4591_v46 = vmul.f32 %v7741_v30, %v4506_v3  ;;  %v5619_v8 = vpop.f32.mrb[56].mxu0 }
 0x7c8   : > { %4637 = vst.msk [vmem:[%s7753_s26 + $0x10] sm:$0xff] %vm512_vm0, %v4621_v7  ;;  %v4608_v54 = vsel %vm4570_vm12, %v4511_v9, %v4592_v57  ;;  %v4521_v61 = vadd.f32 %v5619_v8, %v7736_v42  ;;  %v4515_v38 = vpop.f32.mrb[57].mxu0  ;;  %v6118_v9 = vld [vmem:[%s6660_s1 + $0x68] sm:$0xff] }
 0x7c9   : > { %v4624_v25 = vadd.f32 %v6110_v48, %v4608_v54  ;;  %v4607_v34 = vsel %vm4569_vm13, %v4506_v3, %v4591_v46  ;;  %v4516_v49 = vadd.f32 %v7736_v42, %v4515_v38  ;;  %v6121_v54 = vld [vmem:[%s6660_s1 + $0x70] sm:$0xff] }
 0x7ca   : > { %v4623_v32 = vadd.f32 %v6111_v62, %v4607_v34  ;;  %vm4572_vm14 = vcmp.ge.f32.partialorder %v4521_v61, 0.0  ;;  %v4594_v27 = vmul.f32 %v7741_v30, %v4521_v61 }
 0x7cb   : > { %4640 = vst.msk [vmem:[%s7753_s26 + $0x28] sm:$0xff] %vm512_vm0, %v4624_v25  ;;  %vm4571_vm15 = vcmp.ge.f32.partialorder %v4516_v49, 0.0  ;;  %v4593_v14 = vmul.f32 %v7741_v30, %v4516_v49  ;;  %v5622_v6 = vpop.f32.mrb[58].mxu0 }
 0x7cc   : > { %4639 = vst.msk [vmem:[%s7753_s26 + $0x20] sm:$0xff] %vm512_vm0, %v4623_v32  ;;  %v4610_v4 = vsel %vm4572_vm14, %v4521_v61, %v4594_v27  ;;  %v4531_v2 = vadd.f32 %v5622_v6, %v7736_v42  ;;  %v4525_v17 = vpop.f32.mrb[59].mxu0 }
 0x7cd   : > { %v4626_v18 = vadd.f32 %v6112_v41, %v4610_v4  ;;  %v4609_v28 = vsel %vm4571_vm15, %v4516_v49, %v4593_v14  ;;  %v4526_v50 = vadd.f32 %v7736_v42, %v4525_v17 }
 0x7ce   : > { %v4625_v56 = vadd.f32 %v6113_v58, %v4609_v28  ;;  %vm4574_vm1 = vcmp.ge.f32.partialorder %v4531_v2, 0.0  ;;  %v4596_v40 = vmul.f32 %v7741_v30, %v4531_v2 }
 0x7cf   : > { %4642 = vst.msk [vmem:[%s7753_s26 + $0x38] sm:$0xff] %vm512_vm0, %v4626_v18  ;;  %vm4573_vm2 = vcmp.ge.f32.partialorder %v4526_v50, 0.0  ;;  %v4595_v10 = vmul.f32 %v7741_v30, %v4526_v50  ;;  %v5625_v15 = vpop.f32.mrb[60].mxu0 }
 0x7d0   : > { %4641 = vst.msk [vmem:[%s7753_s26 + $0x30] sm:$0xff] %vm512_vm0, %v4625_v56  ;;  %v4612_v45 = vsel %vm4574_vm1, %v4531_v2, %v4596_v40  ;;  %v4541_v23 = vadd.f32 %v5625_v15, %v7736_v42  ;;  %v4535_v20 = vpop.f32.mrb[61].mxu0 }
 0x7d1   : > { %v4628_v24 = vadd.f32 %v6114_v52, %v4612_v45  ;;  %v4611_v60 = vsel %vm4573_vm2, %v4526_v50, %v4595_v10  ;;  %v4536_v21 = vadd.f32 %v7736_v42, %v4535_v20 }
 0x7d2   : > { %v4627_v44 = vadd.f32 %v6115_v13, %v4611_v60  ;;  %vm4576_vm5 = vcmp.ge.f32.partialorder %v4541_v23, 0.0  ;;  %v4598_v36 = vmul.f32 %v7741_v30, %v4541_v23 }
 0x7d3   : > { %4644 = vst.msk [vmem:[%s7753_s26 + $0x48] sm:$0xff] %vm512_vm0, %v4628_v24  ;;  %vm4575_vm6 = vcmp.ge.f32.partialorder %v4536_v21, 0.0  ;;  %v4597_v63 = vmul.f32 %v7741_v30, %v4536_v21  ;;  %v5628_v22 = vpop.f32.mrb[62].mxu0 }
 0x7d4   : > { %4643 = vst.msk [vmem:[%s7753_s26 + $0x40] sm:$0xff] %vm512_vm0, %v4627_v44  ;;  %v4614_v19 = vsel %vm4576_vm5, %v4541_v23, %v4598_v36  ;;  %v4551_v29 = vadd.f32 %v5628_v22, %v7736_v42  ;;  %v4545_v26 = vpop.f32.mrb[63].mxu0 }
 0x7d5   : > { %v4630_v39 = vadd.f32 %v6116_v11, %v4614_v19  ;;  %v4613_v51 = vsel %vm4575_vm6, %v4536_v21, %v4597_v63  ;;  %v4546_v12 = vadd.f32 %v7736_v42, %v4545_v26 }
 0x7d6   : > { %v4629_v55 = vadd.f32 %v6117_v37, %v4613_v51  ;;  %vm4578_vm7 = vcmp.ge.f32.partialorder %v4551_v29, 0.0  ;;  %v4600_v33 = vmul.f32 %v7741_v30, %v4551_v29 }
 0x7d7   : > { %4646 = vst.msk [vmem:[%s7753_s26 + $0x58] sm:$0xff] %vm512_vm0, %v4630_v39  ;;  %vm4577_vm8 = vcmp.ge.f32.partialorder %v4546_v12, 0.0  ;;  %v4599_v43 = vmul.f32 %v7741_v30, %v4546_v12  ;;  %v5631_v31 = vpop.f32.mrb[64].mxu0 }
 0x7d8   : > { %4645 = vst.msk [vmem:[%s7753_s26 + $0x50] sm:$0xff] %vm512_vm0, %v4629_v55  ;;  %v4616_v47 = vsel %vm4578_vm7, %v4551_v29, %v4600_v33  ;;  %v4561_v0 = vadd.f32 %v5631_v31, %v7736_v42  ;;  %v4555_v16 = vpop.f32.mrb[65].mxu0 }
 0x7d9   : > { %v4632_v59 = vadd.f32 %v6118_v9, %v4616_v47  ;;  %v4615_v5 = vsel %vm4577_vm8, %v4546_v12, %v4599_v43  ;;  %v4556_v1 = vadd.f32 %v7736_v42, %v4555_v16  ;;  %v6120_v42 = vld [vmem:[%s6660_s1 + $0x78] sm:$0xff]  ;;  %s6272_s1 = sshll.u32 %s6365_s29, 4  ;;  %s6273_s1 = int_to_ptr.vmem [resolvable:$false] %s6272_s1 }
 0x7da   : > { %v4631_v3 = vadd.f32 %v6119_v35, %v4615_v5  ;;  %vm4580_vm4 = vcmp.ge.f32.partialorder %v4561_v0, 0.0  ;;  %v4602_v53 = vmul.f32 %v7741_v30, %v4561_v0  ;;  %s6274_s27 = scalar_lea.vmem %s6273_s1, 4096  ;;  %p6275_p4 = scmp.lt.s32.totalorder %s7830_s8, %s6273_s1 }
 0x7db   : > { %4648 = vst.msk [vmem:[%s7753_s26 + $0x68] sm:$0xff] %vm512_vm0, %v4632_v59  ;;  %vm4579_vm3 = vcmp.ge.f32.partialorder %v4556_v1, 0.0  ;;  %v4601_v7 = vmul.f32 %v7741_v30, %v4556_v1  ;;  %p6276_p7 = scmp.lt.s32.totalorder %s6274_s27, %s6268_s28 }
 0x7dc   : > { %4647 = vst.msk [vmem:[%s7753_s26 + $0x60] sm:$0xff] %vm512_vm0, %v4631_v3  ;;  %v4618_v57 = vsel %vm4580_vm4, %v4561_v0, %v4602_v53 }
 0x7dd   : > { %v4634_v46 = vadd.f32 %v6120_v42, %v4618_v57  ;;  %v4617_v8 = vsel %vm4579_vm3, %v4556_v1, %v4601_v7  ;;  %p6277_p5 = por %p6276_p7, %p6275_p4 }
 0x7de   : > { %v4633_v61 = vadd.f32 %v6121_v54, %v4617_v8 }
 0x7df   : > { %4650 = vst.msk [vmem:[%s7753_s26 + $0x78] sm:$0xff] %vm512_vm0, %v4634_v46  ;;  %p6278_p8 = pnand %p6277_p5, %p6271_p6 }
 0x7e0   : > { %4649 = vst.msk [vmem:[%s7753_s26 + $0x70] sm:$0xff] %vm512_vm0, %v4633_v61 }
 0x7e1   : > { %6281 = shalt.err (!%p6278_p8)
}
 0x7e2   : > { %s6282_s30 = scalar_lea.hbm %s7828_s23, 2048  ;;  %s6286_s24 = scalar_lea.hbm %s7957_s17, 4096 }
 0x7e3   : > { %p6283_p11 = scmp.ne.s32.totalorder %s7828_s23, %s6282_s30  ;;  %p6287_p2 = scmp.lt.u32.totalorder %s7828_s23, %s7957_s17 }
 0x7e4   : > { %p6288_p10 = scmp.lt.u32.totalorder %s6286_s24, %s6282_s30  ;;  %p6290_p3 = scmp.lt.u32.totalorder %s6282_s30, %s7828_s23 }
 0x7e5   : > { %p6284_p0 = pnand %p6283_p11, %p7953_p12 }
 0x7e6   : > { %p6289_p13 = por %p6288_p10, %p6287_p2 }
 0x7e7   : > { %p6285_p1 = pneg %p6284_p0 }
 0x7e8   : > { %p6291_p9 = por %p6290_p3, %p6289_p13 }
 0x7ea   : > { %p6292_p6 = pnand %p6291_p9, %p6285_p1 }
 0x7ec   : > { %6295 = shalt.err (!%p6292_p6)
}
 0x7ed   : > { %5854 = dma.vmem_to_hbm [thread:$0]  (%p7953_p12), %s7830_s8, 2048, %s7828_s23, %s4669_s16, %s6363_s12, %s6363_s12, %s6364_s22  }
 0x7ee PF: > { %s7958_s7 = sld [smem:[#allocation18_spill]]  ;;  %s7959_s10 = sld [smem:[#allocation24_spill]] }
 0x7ef   : > { %s7960_s26 = sld [smem:[#allocation20_spill]] }
 0x7f4   : > { %s4718_s9 = sand.u32 1, %s7958_s7   ;;  %p7961_p4 = scmp.ne.s32.totalorder %s7959_s10, 0 }
 0x7f5   : > { %p7962_p7 = scmp.ge.s32.totalorder %s7960_s26, 2  ;;  %s4719_s19 = scalar_lea.sflag [#allocation4], %s4718_s9 }
 0x7f7   : > { %p5873_p5 = pnand %p7962_p7, %p7961_p4 }
 0x7f9   : > { %6325 = dma.done.wait (!%p5873_p5), %s4719_s19, 2048  }
 0x7fa   : > { %6327 = vsyncadd (!%p5873_p5), %s4719_s19, 4294965248  ;;  %s4728_s21 = scalar_lea.sflag [#allocation12], %s4718_s9 }
 0x7fb   : > { %6329 = dma.done.wait (!%p5873_p5), %s4728_s21, 2048  }
 0x7fc   : > { %6331 = vsyncadd (!%p5873_p5), %s4728_s21, 4294965248  ;;  %s7963_s16 = sld [smem:[#allocation21_spill]]  ;;  %s7964_s18 = sld [smem:[#allocation19_spill]] }
 0x7fd   : > { %s7965_s15 = sld [smem:[#allocation22_spill]]  ;;  %s7966_s13 = smov %s6338_s14 }
 0x802   : > { %p31_p12 = scmp.ge.s32.totalorder %s7963_s16, 4   ;;  %s7967_s14 = smov %s7964_s18 }
 0x804   :  { %33 = sbr.rel (!%p31_p12) target bundleno = 17 (0x11), region = 146 }
 0x80b   :  { %4733 = vsyncpa [#allocation3], 1 }
 0x80c   :  { %4735 = vsyncpa [#allocation3 + $0x1], 1 }
 0x80d   :  { %4736 = vsyncpa [#allocation6], 1 }
 0x80e   :  { %4738 = vsyncpa [#allocation6 + $0x1], 1 }
 0x80f   :  { %4739 = vsyncpa [#allocation9], 1 }
 0x810   :  { %4740 = vsyncpa [#allocation4], 1 }
 0x811   :  { %4742 = vsyncpa [#allocation4 + $0x1], 1 }
 0x812   :  { %4743 = vsyncpa [#allocation12], 1 }
 0x813   :  { %4745 = vsyncpa [#allocation12 + $0x1], 1 }

</bundles_post_ra>
